<compile_context>
chip_gen: v5e
topology: v5e:2x2
jax: 0.10.0
libtpu: 0.0.40
codegen_flags: <defaults>
</compile_context>

<pallas_src>
import functools

import jax
import jax.numpy as jnp
from jax.experimental import pallas as pl
from jax.experimental.pallas import tpu as pltpu

_VMEM = functools.partial(pl.BlockSpec, memory_space=pltpu.MemorySpace.VMEM)


# ----------------------------- Pallas kernels -----------------------------
def _bn_sigmoid(z, gamma, beta):
    # Train-mode BatchNorm over rows (biased variance, eps=1e-5) + sigmoid,
    # all in f32.  sigmoid(x) = 1/(1+exp(-x)); approx reciprocal -> EUP slot.
    mean = jnp.mean(z, axis=0, keepdims=True)
    var = jnp.mean(jnp.square(z - mean), axis=0, keepdims=True)
    zn = (z - mean) * jax.lax.rsqrt(var + 1e-5) * gamma + beta
    return pl.reciprocal(1.0 + jnp.exp(-zn), approx=True)


def _conv_stage_kernel(p_ref, w_ref, b_ref, g_ref, beta_ref, o_ref):
    # (conv + 2x2 avgpool) as ONE matmul on pre-built stride-2 patches,
    # fused with bias + BatchNorm2d + sigmoid epilogue (f32).
    acc = jnp.dot(p_ref[...], w_ref[...], preferred_element_type=jnp.float32)
    o_ref[...] = _bn_sigmoid(acc + b_ref[...], g_ref[...], beta_ref[...])


def _fc_head_kernel(x_ref, w1_ref, b1_ref, g1_ref, be1_ref,
                    w2_ref, b2_ref, g2_ref, be2_ref,
                    w3_ref, b3_ref, o_ref):
    # Linear(400,120)+BN+sig -> Linear(120,84)+BN+sig -> Linear(84,10)+softmax,
    # all VMEM-resident; only the (B,10) result is written back.
    h = jnp.dot(x_ref[...], w1_ref[...], preferred_element_type=jnp.float32)
    h = _bn_sigmoid(h + b1_ref[...], g1_ref[...], be1_ref[...])
    h = jnp.dot(h.astype(w2_ref.dtype), w2_ref[...],
                preferred_element_type=jnp.float32)
    h = _bn_sigmoid(h + b2_ref[...], g2_ref[...], be2_ref[...])
    z = jnp.dot(h.astype(w3_ref.dtype), w3_ref[...],
                preferred_element_type=jnp.float32) + b3_ref[...]
    m = jnp.max(z, axis=1, keepdims=True)
    e = jnp.exp(z - m)
    o_ref[...] = e / jnp.sum(e, axis=1, keepdims=True)   # exact: sums to 1


# ----------------------------- kernel wrappers -----------------------------
def conv_stage(patches, w, bias, gamma, beta):
    m, n = patches.shape[0], w.shape[1]
    return pl.pallas_call(
        _conv_stage_kernel,
        out_shape=jax.ShapeDtypeStruct((m, n), jnp.float32),
        in_specs=[_VMEM()] * 5,
        out_specs=_VMEM(),
    )(patches, w, bias, gamma, beta)


def fc_head(f, w1, b1, g1, be1, w2, b2, g2, be2, w3, b3):
    b = f.shape[0]
    return pl.pallas_call(
        _fc_head_kernel,
        out_shape=jax.ShapeDtypeStruct((b, 10), jnp.float32),
        in_specs=[_VMEM()] * 11,
        out_specs=_VMEM(),
    )(f, w1, b1, g1, be1, w2, b2, g2, be2, w3, b3)


# ----------------------------- host-side glue -----------------------------
def _pooled_conv_weight(w):
    # w: (Co, Ci, 5, 5) PyTorch conv weight.  Returns the (6*6*Ci, Co) weight
    # of the equivalent stride-2 conv computing conv(k=5) followed by a
    # 2x2/stride-2 average pool.  Feature order: (kh, kw, ci).
    co, ci, k, _ = w.shape
    we = jnp.zeros((co, ci, k + 1, k + 1), jnp.float32)
    for dy in range(2):
        for dx in range(2):
            we = we.at[:, :, dy:dy + k, dx:dx + k].add(w)
    we = 0.25 * we
    we = we.transpose(2, 3, 1, 0)                       # (6, 6, Ci, Co)
    return we.reshape((k + 1) * (k + 1) * ci, co)


def _im2col_stride2(x, k):
    # x: (B, H, W, C) NHWC -> (B*Ho*Wo, k*k*C) patches for a stride-2, kxk
    # valid conv.  Feature order (kh, kw, c) matches _pooled_conv_weight.
    b, h, w, c = x.shape
    ho = (h - k) // 2 + 1
    wo = (w - k) // 2 + 1
    cols = [x[:, ky:ky + 2 * (ho - 1) + 1:2, kx:kx + 2 * (wo - 1) + 1:2, :]
            for ky in range(k) for kx in range(k)]
    p = jnp.stack(cols, axis=3)                         # (B, Ho, Wo, k*k, C)
    return p.reshape(b * ho * wo, k * k * c)


def prepare_params(p):
    # One-time weight prep: fold pooling into conv weights, permute fc1 to the
    # NHWC flatten order, pre-transpose all fc weights, cast matmul operands
    # to bf16, hoist bias/BN vectors to (1, C) f32 rows.
    bf16 = jnp.bfloat16

    def row(v):
        return jnp.asarray(v, jnp.float32).reshape(1, -1)

    fc1 = p["fc1_w"].reshape(120, 16, 5, 5).transpose(0, 2, 3, 1).reshape(120, 400)
    return dict(
        w1=_pooled_conv_weight(p["conv1_w"]).astype(bf16),     # (36, 6)
        b1=row(p["conv1_b"]), g1=row(p["bn1_g"]), be1=row(p["bn1_b"]),
        w2=_pooled_conv_weight(p["conv2_w"]).astype(bf16),     # (216, 16)
        b2=row(p["conv2_b"]), g2=row(p["bn2_g"]), be2=row(p["bn2_b"]),
        w3=fc1.T.astype(bf16), b3=row(p["fc1_b"]),             # (400, 120)
        g3=row(p["bn3_g"]), be3=row(p["bn3_b"]),
        w4=p["fc2_w"].T.astype(bf16), b4=row(p["fc2_b"]),      # (120, 84)
        g4=row(p["bn4_g"]), be4=row(p["bn4_b"]),
        w5=p["fc3_w"].T.astype(bf16), b5=row(p["fc3_b"]),      # (84, 10)
    )


# ----------------------------- forward pass -----------------------------
def lenet_forward(x, kp):
    """x: (B, 1, 28, 28) NCHW float32 (PyTorch layout); kp: prepare_params()."""
    b = x.shape[0]

    # Conv2d(1,6,k=5,pad=2) + AvgPool2d(2,2) + BatchNorm2d(6) + Sigmoid
    xh = x.astype(jnp.bfloat16).transpose(0, 2, 3, 1)            # NHWC (B,28,28,1)
    xh = jnp.pad(xh, ((0, 0), (2, 2), (2, 2), (0, 0)))           # padding=2
    p1 = _im2col_stride2(xh, 6)                                  # (B*196, 36)
    y1 = conv_stage(p1, kp["w1"], kp["b1"], kp["g1"], kp["be1"])  # (B*196, 6)

    # Conv2d(6,16,k=5) + AvgPool2d(2,2) + BatchNorm2d(16) + Sigmoid
    p2 = _im2col_stride2(y1.reshape(b, 14, 14, 6).astype(jnp.bfloat16), 6)
    y2 = conv_stage(p2, kp["w2"], kp["b2"], kp["g2"], kp["be2"])  # (B*25, 16)

    # Flatten (NHWC order; fc1 weight columns were permuted to match) + FC head
    f = y2.reshape(b, 400).astype(jnp.bfloat16)
    return fc_head(f, kp["w3"], kp["b3"], kp["g3"], kp["be3"],
                   kp["w4"], kp["b4"], kp["g4"], kp["be4"],
                   kp["w5"], kp["b5"])


# ----------------------------- parameters -----------------------------
def init_params(key):
    ks = jax.random.split(key, 5)

    def w(k, shape, fan_in):
        return jax.random.normal(k, shape, jnp.float32) / jnp.sqrt(
            jnp.float32(fan_in))

    return dict(
        conv1_w=w(ks[0], (6, 1, 5, 5), 25), conv1_b=jnp.zeros((6,), jnp.float32),
        conv2_w=w(ks[1], (16, 6, 5, 5), 150), conv2_b=jnp.zeros((16,), jnp.float32),
        fc1_w=w(ks[2], (120, 400), 400), fc1_b=jnp.zeros((120,), jnp.float32),
        fc2_w=w(ks[3], (84, 120), 120), fc2_b=jnp.zeros((84,), jnp.float32),
        fc3_w=w(ks[4], (10, 84), 84), fc3_b=jnp.zeros((10,), jnp.float32),
        bn1_g=jnp.ones((6,), jnp.float32), bn1_b=jnp.zeros((6,), jnp.float32),
        bn2_g=jnp.ones((16,), jnp.float32), bn2_b=jnp.zeros((16,), jnp.float32),
        bn3_g=jnp.ones((120,), jnp.float32), bn3_b=jnp.zeros((120,), jnp.float32),
        bn4_g=jnp.ones((84,), jnp.float32), bn4_b=jnp.zeros((84,), jnp.float32),
    )


if __name__ == "__main__":
    key = jax.random.PRNGKey(0)
    pkey, xkey = jax.random.split(key)
    params = init_params(pkey)
    kparams = prepare_params(params)                      # one-time weight prep
    x = jax.random.normal(xkey, (2, 1, 28, 28), jnp.float32)   # NCHW like torch

    out = jax.jit(lenet_forward)(x, kparams)
    out = jax.block_until_ready(out)

    assert out.shape == (2, 10), out.shape
    assert bool(jnp.all(jnp.isfinite(out)))
    assert bool(jnp.allclose(jnp.sum(out, axis=1), 1.0, atol=1e-4))
    print("KERNEL_OK")
</pallas_src>

<mosaic_0001>
module attributes {stable_mosaic.version = 11 : i64} {
  func.func @_conv_stage_kernel(%arg0: memref<392x36xbf16, #tpu.memory_space<vmem>>, %arg1: memref<36x6xbf16, #tpu.memory_space<vmem>>, %arg2: memref<1x6xf32, #tpu.memory_space<vmem>>, %arg3: memref<1x6xf32, #tpu.memory_space<vmem>>, %arg4: memref<1x6xf32, #tpu.memory_space<vmem>>, %arg5: memref<392x6xf32, #tpu.memory_space<vmem>>) attributes {dimension_semantics = [], scalar_prefetch = 0 : i64, scratch_operands = 0 : i64, tpu.core_type = #tpu.core_type<tc>} {
    %c0 = arith.constant 0 : index
    %c0_0 = arith.constant 0 : index
    %0 = vector.load %arg0[%c0, %c0_0] : memref<392x36xbf16, #tpu.memory_space<vmem>>, vector<392x36xbf16>
    %c0_1 = arith.constant 0 : index
    %c0_2 = arith.constant 0 : index
    %1 = vector.load %arg1[%c0_1, %c0_2] : memref<36x6xbf16, #tpu.memory_space<vmem>>, vector<36x6xbf16>
    %cst = arith.constant dense<0.000000e+00> : vector<392x6xf32>
    %2 = tpu.matmul %0, %1, %cst {dimension_numbers = #tpu.dot_dimension_numbers<[1], [0], [0], [1], [0, 0, 1, 1], [], []>} : vector<392x36xbf16>, vector<36x6xbf16>, vector<392x6xf32> -> vector<392x6xf32>
    %c0_3 = arith.constant 0 : index
    %c0_4 = arith.constant 0 : index
    %3 = vector.load %arg2[%c0_3, %c0_4] : memref<1x6xf32, #tpu.memory_space<vmem>>, vector<1x6xf32>
    %4 = vector.broadcast %3 : vector<1x6xf32> to vector<392x6xf32>
    %5 = arith.addf %2, %4 : vector<392x6xf32>
    %c0_5 = arith.constant 0 : index
    %c0_6 = arith.constant 0 : index
    %6 = vector.load %arg3[%c0_5, %c0_6] : memref<1x6xf32, #tpu.memory_space<vmem>>, vector<1x6xf32>
    %c0_7 = arith.constant 0 : index
    %c0_8 = arith.constant 0 : index
    %7 = vector.load %arg4[%c0_7, %c0_8] : memref<1x6xf32, #tpu.memory_space<vmem>>, vector<1x6xf32>
    %cst_9 = arith.constant dense<0.000000e+00> : vector<6xf32>
    %8 = vector.multi_reduction <add>, %5, %cst_9 [0] : vector<392x6xf32> to vector<6xf32>
    %9 = vector.shape_cast %8 : vector<6xf32> to vector<1x6xf32>
    %cst_10 = arith.constant 3.920000e+02 : f32
    %10 = vector.broadcast %cst_10 : f32 to vector<1x6xf32>
    %11 = arith.divf %9, %10 : vector<1x6xf32>
    %12 = vector.broadcast %11 : vector<1x6xf32> to vector<392x6xf32>
    %13 = arith.subf %5, %12 : vector<392x6xf32>
    %14 = arith.mulf %13, %13 : vector<392x6xf32>
    %cst_11 = arith.constant dense<0.000000e+00> : vector<6xf32>
    %15 = vector.multi_reduction <add>, %14, %cst_11 [0] : vector<392x6xf32> to vector<6xf32>
    %16 = vector.shape_cast %15 : vector<6xf32> to vector<1x6xf32>
    %cst_12 = arith.constant 3.920000e+02 : f32
    %17 = vector.broadcast %cst_12 : f32 to vector<1x6xf32>
    %18 = arith.divf %16, %17 : vector<1x6xf32>
    %19 = vector.broadcast %11 : vector<1x6xf32> to vector<392x6xf32>
    %20 = arith.subf %5, %19 : vector<392x6xf32>
    %cst_13 = arith.constant 9.99999974E-6 : f32
    %21 = vector.broadcast %cst_13 : f32 to vector<1x6xf32>
    %22 = arith.addf %18, %21 : vector<1x6xf32>
    %23 = math.rsqrt %22 : vector<1x6xf32>
    %24 = vector.broadcast %23 : vector<1x6xf32> to vector<392x6xf32>
    %25 = arith.mulf %20, %24 : vector<392x6xf32>
    %26 = vector.broadcast %6 : vector<1x6xf32> to vector<392x6xf32>
    %27 = arith.mulf %25, %26 : vector<392x6xf32>
    %28 = vector.broadcast %7 : vector<1x6xf32> to vector<392x6xf32>
    %29 = arith.addf %27, %28 : vector<392x6xf32>
    %cst_14 = arith.constant 0.000000e+00 : f32
    %30 = vector.broadcast %cst_14 : f32 to vector<392x6xf32>
    %31 = arith.subf %30, %29 : vector<392x6xf32>
    %32 = math.exp %31 : vector<392x6xf32>
    %cst_15 = arith.constant 1.000000e+00 : f32
    %33 = vector.broadcast %cst_15 : f32 to vector<392x6xf32>
    %34 = arith.addf %33, %32 : vector<392x6xf32>
    %35 = tpu.reciprocal %34 {approx = true} : vector<392x6xf32> -> vector<392x6xf32>
    %c0_16 = arith.constant 0 : index
    %c0_17 = arith.constant 0 : index
    %36 = vector.load %arg5[%c0_16, %c0_17] : memref<392x6xf32, #tpu.memory_space<vmem>>, vector<392x6xf32>
    tpu.vector_store %arg5[%c0_16, %c0_17], %35 {strides = array<i32>} : memref<392x6xf32, #tpu.memory_space<vmem>>, vector<392x6xf32>,
    return
  }
}

module attributes {stable_mosaic.version = 11 : i64} {
  func.func @_conv_stage_kernel(%arg0: memref<50x216xbf16, #tpu.memory_space<vmem>>, %arg1: memref<216x16xbf16, #tpu.memory_space<vmem>>, %arg2: memref<1x16xf32, #tpu.memory_space<vmem>>, %arg3: memref<1x16xf32, #tpu.memory_space<vmem>>, %arg4: memref<1x16xf32, #tpu.memory_space<vmem>>, %arg5: memref<50x16xf32, #tpu.memory_space<vmem>>) attributes {dimension_semantics = [], scalar_prefetch = 0 : i64, scratch_operands = 0 : i64, tpu.core_type = #tpu.core_type<tc>} {
    %c0 = arith.constant 0 : index
    %c0_0 = arith.constant 0 : index
    %0 = vector.load %arg0[%c0, %c0_0] : memref<50x216xbf16, #tpu.memory_space<vmem>>, vector<50x216xbf16>
    %c0_1 = arith.constant 0 : index
    %c0_2 = arith.constant 0 : index
    %1 = vector.load %arg1[%c0_1, %c0_2] : memref<216x16xbf16, #tpu.memory_space<vmem>>, vector<216x16xbf16>
    %cst = arith.constant dense<0.000000e+00> : vector<50x16xf32>
    %2 = tpu.matmul %0, %1, %cst {dimension_numbers = #tpu.dot_dimension_numbers<[1], [0], [0], [1], [0, 0, 1, 1], [], []>} : vector<50x216xbf16>, vector<216x16xbf16>, vector<50x16xf32> -> vector<50x16xf32>
    %c0_3 = arith.constant 0 : index
    %c0_4 = arith.constant 0 : index
    %3 = vector.load %arg2[%c0_3, %c0_4] : memref<1x16xf32, #tpu.memory_space<vmem>>, vector<1x16xf32>
    %4 = vector.broadcast %3 : vector<1x16xf32> to vector<50x16xf32>
    %5 = arith.addf %2, %4 : vector<50x16xf32>
    %c0_5 = arith.constant 0 : index
    %c0_6 = arith.constant 0 : index
    %6 = vector.load %arg3[%c0_5, %c0_6] : memref<1x16xf32, #tpu.memory_space<vmem>>, vector<1x16xf32>
    %c0_7 = arith.constant 0 : index
    %c0_8 = arith.constant 0 : index
    %7 = vector.load %arg4[%c0_7, %c0_8] : memref<1x16xf32, #tpu.memory_space<vmem>>, vector<1x16xf32>
    %cst_9 = arith.constant dense<0.000000e+00> : vector<16xf32>
    %8 = vector.multi_reduction <add>, %5, %cst_9 [0] : vector<50x16xf32> to vector<16xf32>
    %9 = vector.shape_cast %8 : vector<16xf32> to vector<1x16xf32>
    %cst_10 = arith.constant 5.000000e+01 : f32
    %10 = vector.broadcast %cst_10 : f32 to vector<1x16xf32>
    %11 = arith.divf %9, %10 : vector<1x16xf32>
    %12 = vector.broadcast %11 : vector<1x16xf32> to vector<50x16xf32>
    %13 = arith.subf %5, %12 : vector<50x16xf32>
    %14 = arith.mulf %13, %13 : vector<50x16xf32>
    %cst_11 = arith.constant dense<0.000000e+00> : vector<16xf32>
    %15 = vector.multi_reduction <add>, %14, %cst_11 [0] : vector<50x16xf32> to vector<16xf32>
    %16 = vector.shape_cast %15 : vector<16xf32> to vector<1x16xf32>
    %cst_12 = arith.constant 5.000000e+01 : f32
    %17 = vector.broadcast %cst_12 : f32 to vector<1x16xf32>
    %18 = arith.divf %16, %17 : vector<1x16xf32>
    %19 = vector.broadcast %11 : vector<1x16xf32> to vector<50x16xf32>
    %20 = arith.subf %5, %19 : vector<50x16xf32>
    %cst_13 = arith.constant 9.99999974E-6 : f32
    %21 = vector.broadcast %cst_13 : f32 to vector<1x16xf32>
    %22 = arith.addf %18, %21 : vector<1x16xf32>
    %23 = math.rsqrt %22 : vector<1x16xf32>
    %24 = vector.broadcast %23 : vector<1x16xf32> to vector<50x16xf32>
    %25 = arith.mulf %20, %24 : vector<50x16xf32>
    %26 = vector.broadcast %6 : vector<1x16xf32> to vector<50x16xf32>
    %27 = arith.mulf %25, %26 : vector<50x16xf32>
    %28 = vector.broadcast %7 : vector<1x16xf32> to vector<50x16xf32>
    %29 = arith.addf %27, %28 : vector<50x16xf32>
    %cst_14 = arith.constant 0.000000e+00 : f32
    %30 = vector.broadcast %cst_14 : f32 to vector<50x16xf32>
    %31 = arith.subf %30, %29 : vector<50x16xf32>
    %32 = math.exp %31 : vector<50x16xf32>
    %cst_15 = arith.constant 1.000000e+00 : f32
    %33 = vector.broadcast %cst_15 : f32 to vector<50x16xf32>
    %34 = arith.addf %33, %32 : vector<50x16xf32>
    %35 = tpu.reciprocal %34 {approx = true} : vector<50x16xf32> -> vector<50x16xf32>
    %c0_16 = arith.constant 0 : index
    %c0_17 = arith.constant 0 : index
    %36 = vector.load %arg5[%c0_16, %c0_17] : memref<50x16xf32, #tpu.memory_space<vmem>>, vector<50x16xf32>
    tpu.vector_store %arg5[%c0_16, %c0_17], %35 {strides = array<i32>} : memref<50x16xf32, #tpu.memory_space<vmem>>, vector<50x16xf32>,
    return
  }
}

module attributes {stable_mosaic.version = 11 : i64} {
  func.func @_fc_head_kernel(%arg0: memref<2x400xbf16, #tpu.memory_space<vmem>>, %arg1: memref<400x120xbf16, #tpu.memory_space<vmem>>, %arg2: memref<1x120xf32, #tpu.memory_space<vmem>>, %arg3: memref<1x120xf32, #tpu.memory_space<vmem>>, %arg4: memref<1x120xf32, #tpu.memory_space<vmem>>, %arg5: memref<120x84xbf16, #tpu.memory_space<vmem>>, %arg6: memref<1x84xf32, #tpu.memory_space<vmem>>, %arg7: memref<1x84xf32, #tpu.memory_space<vmem>>, %arg8: memref<1x84xf32, #tpu.memory_space<vmem>>, %arg9: memref<84x10xbf16, #tpu.memory_space<vmem>>, %arg10: memref<1x10xf32, #tpu.memory_space<vmem>>, %arg11: memref<2x10xf32, #tpu.memory_space<vmem>>) attributes {dimension_semantics = [], scalar_prefetch = 0 : i64, scratch_operands = 0 : i64, tpu.core_type = #tpu.core_type<tc>} {
    %c0 = arith.constant 0 : index
    %c0_0 = arith.constant 0 : index
    %0 = vector.load %arg0[%c0, %c0_0] : memref<2x400xbf16, #tpu.memory_space<vmem>>, vector<2x400xbf16>
    %c0_1 = arith.constant 0 : index
    %c0_2 = arith.constant 0 : index
    %1 = vector.load %arg1[%c0_1, %c0_2] : memref<400x120xbf16, #tpu.memory_space<vmem>>, vector<400x120xbf16>
    %cst = arith.constant dense<0.000000e+00> : vector<2x120xf32>
    %2 = tpu.matmul %0, %1, %cst {dimension_numbers = #tpu.dot_dimension_numbers<[1], [0], [0], [1], [0, 0, 1, 1], [], []>} : vector<2x400xbf16>, vector<400x120xbf16>, vector<2x120xf32> -> vector<2x120xf32>
    %c0_3 = arith.constant 0 : index
    %c0_4 = arith.constant 0 : index
    %3 = vector.load %arg2[%c0_3, %c0_4] : memref<1x120xf32, #tpu.memory_space<vmem>>, vector<1x120xf32>
    %4 = vector.broadcast %3 : vector<1x120xf32> to vector<2x120xf32>
    %5 = arith.addf %2, %4 : vector<2x120xf32>
    %c0_5 = arith.constant 0 : index
    %c0_6 = arith.constant 0 : index
    %6 = vector.load %arg3[%c0_5, %c0_6] : memref<1x120xf32, #tpu.memory_space<vmem>>, vector<1x120xf32>
    %c0_7 = arith.constant 0 : index
    %c0_8 = arith.constant 0 : index
    %7 = vector.load %arg4[%c0_7, %c0_8] : memref<1x120xf32, #tpu.memory_space<vmem>>, vector<1x120xf32>
    %cst_9 = arith.constant dense<0.000000e+00> : vector<120xf32>
    %8 = vector.multi_reduction <add>, %5, %cst_9 [0] : vector<2x120xf32> to vector<120xf32>
    %9 = vector.shape_cast %8 : vector<120xf32> to vector<1x120xf32>
    %cst_10 = arith.constant 2.000000e+00 : f32
    %10 = vector.broadcast %cst_10 : f32 to vector<1x120xf32>
    %11 = arith.divf %9, %10 : vector<1x120xf32>
    %12 = vector.broadcast %11 : vector<1x120xf32> to vector<2x120xf32>
    %13 = arith.subf %5, %12 : vector<2x120xf32>
    %14 = arith.mulf %13, %13 : vector<2x120xf32>
    %cst_11 = arith.constant dense<0.000000e+00> : vector<120xf32>
    %15 = vector.multi_reduction <add>, %14, %cst_11 [0] : vector<2x120xf32> to vector<120xf32>
    %16 = vector.shape_cast %15 : vector<120xf32> to vector<1x120xf32>
    %cst_12 = arith.constant 2.000000e+00 : f32
    %17 = vector.broadcast %cst_12 : f32 to vector<1x120xf32>
    %18 = arith.divf %16, %17 : vector<1x120xf32>
    %19 = vector.broadcast %11 : vector<1x120xf32> to vector<2x120xf32>
    %20 = arith.subf %5, %19 : vector<2x120xf32>
    %cst_13 = arith.constant 9.99999974E-6 : f32
    %21 = vector.broadcast %cst_13 : f32 to vector<1x120xf32>
    %22 = arith.addf %18, %21 : vector<1x120xf32>
    %23 = math.rsqrt %22 : vector<1x120xf32>
    %24 = vector.broadcast %23 : vector<1x120xf32> to vector<2x120xf32>
    %25 = arith.mulf %20, %24 : vector<2x120xf32>
    %26 = vector.broadcast %6 : vector<1x120xf32> to vector<2x120xf32>
    %27 = arith.mulf %25, %26 : vector<2x120xf32>
    %28 = vector.broadcast %7 : vector<1x120xf32> to vector<2x120xf32>
    %29 = arith.addf %27, %28 : vector<2x120xf32>
    %cst_14 = arith.constant 0.000000e+00 : f32
    %30 = vector.broadcast %cst_14 : f32 to vector<2x120xf32>
    %31 = arith.subf %30, %29 : vector<2x120xf32>
    %32 = math.exp %31 : vector<2x120xf32>
    %cst_15 = arith.constant 1.000000e+00 : f32
    %33 = vector.broadcast %cst_15 : f32 to vector<2x120xf32>
    %34 = arith.addf %33, %32 : vector<2x120xf32>
    %35 = tpu.reciprocal %34 {approx = true} : vector<2x120xf32> -> vector<2x120xf32>
    %36 = arith.truncf %35 : vector<2x120xf32> to vector<2x120xbf16>
    %c0_16 = arith.constant 0 : index
    %c0_17 = arith.constant 0 : index
    %37 = vector.load %arg5[%c0_16, %c0_17] : memref<120x84xbf16, #tpu.memory_space<vmem>>, vector<120x84xbf16>
    %cst_18 = arith.constant dense<0.000000e+00> : vector<2x84xf32>
    %38 = tpu.matmul %36, %37, %cst_18 {dimension_numbers = #tpu.dot_dimension_numbers<[1], [0], [0], [1], [0, 0, 1, 1], [], []>} : vector<2x120xbf16>, vector<120x84xbf16>, vector<2x84xf32> -> vector<2x84xf32>
    %c0_19 = arith.constant 0 : index
    %c0_20 = arith.constant 0 : index
    %39 = vector.load %arg6[%c0_19, %c0_20] : memref<1x84xf32, #tpu.memory_space<vmem>>, vector<1x84xf32>
    %40 = vector.broadcast %39 : vector<1x84xf32> to vector<2x84xf32>
    %41 = arith.addf %38, %40 : vector<2x84xf32>
    %c0_21 = arith.constant 0 : index
    %c0_22 = arith.constant 0 : index
    %42 = vector.load %arg7[%c0_21, %c0_22] : memref<1x84xf32, #tpu.memory_space<vmem>>, vector<1x84xf32>
    %c0_23 = arith.constant 0 : index
    %c0_24 = arith.constant 0 : index
    %43 = vector.load %arg8[%c0_23, %c0_24] : memref<1x84xf32, #tpu.memory_space<vmem>>, vector<1x84xf32>
    %cst_25 = arith.constant dense<0.000000e+00> : vector<84xf32>
    %44 = vector.multi_reduction <add>, %41, %cst_25 [0] : vector<2x84xf32> to vector<84xf32>
    %45 = vector.shape_cast %44 : vector<84xf32> to vector<1x84xf32>
    %cst_26 = arith.constant 2.000000e+00 : f32
    %46 = vector.broadcast %cst_26 : f32 to vector<1x84xf32>
    %47 = arith.divf %45, %46 : vector<1x84xf32>
    %48 = vector.broadcast %47 : vector<1x84xf32> to vector<2x84xf32>
    %49 = arith.subf %41, %48 : vector<2x84xf32>
    %50 = arith.mulf %49, %49 : vector<2x84xf32>
    %cst_27 = arith.constant dense<0.000000e+00> : vector<84xf32>
    %51 = vector.multi_reduction <add>, %50, %cst_27 [0] : vector<2x84xf32> to vector<84xf32>
    %52 = vector.shape_cast %51 : vector<84xf32> to vector<1x84xf32>
    %cst_28 = arith.constant 2.000000e+00 : f32
    %53 = vector.broadcast %cst_28 : f32 to vector<1x84xf32>
    %54 = arith.divf %52, %53 : vector<1x84xf32>
    %55 = vector.broadcast %47 : vector<1x84xf32> to vector<2x84xf32>
    %56 = arith.subf %41, %55 : vector<2x84xf32>
    %cst_29 = arith.constant 9.99999974E-6 : f32
    %57 = vector.broadcast %cst_29 : f32 to vector<1x84xf32>
    %58 = arith.addf %54, %57 : vector<1x84xf32>
    %59 = math.rsqrt %58 : vector<1x84xf32>
    %60 = vector.broadcast %59 : vector<1x84xf32> to vector<2x84xf32>
    %61 = arith.mulf %56, %60 : vector<2x84xf32>
    %62 = vector.broadcast %42 : vector<1x84xf32> to vector<2x84xf32>
    %63 = arith.mulf %61, %62 : vector<2x84xf32>
    %64 = vector.broadcast %43 : vector<1x84xf32> to vector<2x84xf32>
    %65 = arith.addf %63, %64 : vector<2x84xf32>
    %cst_30 = arith.constant 0.000000e+00 : f32
    %66 = vector.broadcast %cst_30 : f32 to vector<2x84xf32>
    %67 = arith.subf %66, %65 : vector<2x84xf32>
    %68 = math.exp %67 : vector<2x84xf32>
    %cst_31 = arith.constant 1.000000e+00 : f32
    %69 = vector.broadcast %cst_31 : f32 to vector<2x84xf32>
    %70 = arith.addf %69, %68 : vector<2x84xf32>
    %71 = tpu.reciprocal %70 {approx = true} : vector<2x84xf32> -> vector<2x84xf32>
    %72 = arith.truncf %71 : vector<2x84xf32> to vector<2x84xbf16>
    %c0_32 = arith.constant 0 : index
    %c0_33 = arith.constant 0 : index
    %73 = vector.load %arg9[%c0_32, %c0_33] : memref<84x10xbf16, #tpu.memory_space<vmem>>, vector<84x10xbf16>
    %cst_34 = arith.constant dense<0.000000e+00> : vector<2x10xf32>
    %74 = tpu.matmul %72, %73, %cst_34 {dimension_numbers = #tpu.dot_dimension_numbers<[1], [0], [0], [1], [0, 0, 1, 1], [], []>} : vector<2x84xbf16>, vector<84x10xbf16>, vector<2x10xf32> -> vector<2x10xf32>
    %c0_35 = arith.constant 0 : index
    %c0_36 = arith.constant 0 : index
    %75 = vector.load %arg10[%c0_35, %c0_36] : memref<1x10xf32, #tpu.memory_space<vmem>>, vector<1x10xf32>
    %76 = vector.broadcast %75 : vector<1x10xf32> to vector<2x10xf32>
    %77 = arith.addf %74, %76 : vector<2x10xf32>
    %cst_37 = arith.constant dense<0xFF800000> : vector<2xf32>
    %78 = vector.multi_reduction <maximumf>, %77, %cst_37 [1] : vector<2x10xf32> to vector<2xf32>
    %79 = vector.shape_cast %78 : vector<2xf32> to vector<2x1xf32>
    %80 = vector.broadcast %79 : vector<2x1xf32> to vector<2x10xf32>
    %81 = arith.subf %77, %80 : vector<2x10xf32>
    %82 = math.exp %81 : vector<2x10xf32>
    %cst_38 = arith.constant dense<0.000000e+00> : vector<2xf32>
    %83 = vector.multi_reduction <add>, %82, %cst_38 [1] : vector<2x10xf32> to vector<2xf32>
    %84 = vector.shape_cast %83 : vector<2xf32> to vector<2x1xf32>
    %85 = vector.broadcast %84 : vector<2x1xf32> to vector<2x10xf32>
    %86 = arith.divf %82, %85 : vector<2x10xf32>
    %c0_39 = arith.constant 0 : index
    %c0_40 = arith.constant 0 : index
    %87 = vector.load %arg11[%c0_39, %c0_40] : memref<2x10xf32, #tpu.memory_space<vmem>>, vector<2x10xf32>
    tpu.vector_store %arg11[%c0_39, %c0_40], %86 {strides = array<i32>} : memref<2x10xf32, #tpu.memory_space<vmem>>, vector<2x10xf32>,
    return
  }
}

</mosaic_0001>

<bundles_post_ra>
// kernel: lenet_forward.3
= control target key start
LH: loop header
LB: loop body
LE: loop exit
PB: predicated region body
PF: predicated region fallthrough
CT: control target
= control target key end

     0   :  { %vm293_vm0 = vcmask 1041408   ;;  %vm217_vm1 = vcmask 293888   ;;  %vm432_vm2 = vcmask 48128   ;;  %s3006_s1 = inlined_call_operand.vmem [shape: bf16[36,6], index: 1, kind: input, shape index: {}]   ;;  %s3007_s2 = inlined_call_operand.vmem [shape: f32[1,6], index: 2, kind: input, shape index: {}]   ;;  %s3008_s0 = inlined_call_operand.vmem [shape: bf16[392,36], index: 0, kind: input, shape index: {}]   ;;  %s3009_s3 = inlined_call_operand.vmem [shape: f32[1,6], index: 3, kind: input, shape index: {}]   ;;  %s3010_s4 = inlined_call_operand.vmem [shape: f32[1,6], index: 4, kind: input, shape index: {}]   ;;  %s3011_s5 = inlined_call_operand.vmem [shape: f32[392,6], index: 5, kind: output, shape index: {}]  }
   0x1   :  { %v74_v0 = vld [vmem:[%s3006_s1 + $0x10] sm:$0x3]  ;;  %v1362_v4 = vld [vmem:[%s3006_s1 + $0x8] sm:$0xff]  ;;  %v1361_v5 = vld [vmem:[%s3006_s1] sm:$0xff] }
   0x2   :  { %v211_v1 = vunpack.c.l.b16 %v74_v0  ;;  %v1337_v6 = vld [vmem:[%s3008_s0] sm:$0xff]  ;;  %v1343_v7 = vld [vmem:[%s3008_s0 + $0x30] sm:$0xff]  ;;  %v1350_v8 = vld [vmem:[%s3008_s0 + $0x68] sm:$0xff] }
   0x3   :  { %v1338_v9 = vld [vmem:[%s3008_s0 + $0x8] sm:$0xff]  ;;  %v1344_v10 = vld [vmem:[%s3008_s0 + $0x38] sm:$0xff]  ;;  %v1351_v11 = vld [vmem:[%s3008_s0 + $0x70] sm:$0xff] }
   0x4   :  { %v214_v2 = vpack.c.b16 %v211_v1, %v211_v1  ;;  %v1339_v12 = vld [vmem:[%s3008_s0 + $0x10] sm:$0xff]  ;;  %v1345_v13 = vld [vmem:[%s3008_s0 + $0x40] sm:$0xff]  ;;  %v1352_v14 = vld [vmem:[%s3008_s0 + $0x78] sm:$0xff] }
   0x5   :  { %v1340_v15 = vld [vmem:[%s3008_s0 + $0x18] sm:$0xff]  ;;  %v1346_v16 = vld [vmem:[%s3008_s0 + $0x48] sm:$0xff]  ;;  %v1353_v17 = vld [vmem:[%s3008_s0 + $0x80] sm:$0xff] }
   0x6   :  { %v295_v3 = vsel %vm293_vm0, %v214_v2, 0  ;;  %v1357_v18 = vld [vmem:[%s3008_s0 + $0xa0] sm:$0xff]  ;;  %v1347_v20 = vld [vmem:[%s3008_s0 + $0x50] sm:$0xff]  ;;  %v1354_v21 = vld [vmem:[%s3008_s0 + $0x88] sm:$0xff] }
   0x7   :  { %302 = vmatpush.bf16.msra.mxu0 %v295_v3  ;;  %1363 = vmatpush.bf16.msra.mxu1 %v295_v3  ;;  %v1341_v19 = vld [vmem:[%s3008_s0 + $0x20] sm:$0xff]  ;;  %v1358_v22 = vld [vmem:[%s3008_s0 + $0xa8] sm:$0xff]  ;;  %v1348_v24 = vld [vmem:[%s3008_s0 + $0x58] sm:$0xff] }
   0x8   :  { %1364 = vmatpush.bf16.msra.mxu2 %v295_v3  ;;  %1365 = vmatpush.bf16.msra.mxu3 %v295_v3  ;;  %v1342_v23 = vld [vmem:[%s3008_s0 + $0x28] sm:$0xff]  ;;  %v1355_v25 = vld [vmem:[%s3008_s0 + $0x90] sm:$0xff]  ;;  %v1349_v27 = vld [vmem:[%s3008_s0 + $0x60] sm:$0xff] }
   0x9   :  { %v1359_v26 = vld [vmem:[%s3008_s0 + $0xb0] sm:$0xff]  ;;  %v1356_v28 = vld [vmem:[%s3008_s0 + $0x98] sm:$0xff]  ;;  %v69_v30 = vld [vmem:[%s3008_s0 + $0xc0] sm:$0xf] }
   0xa   :  { %v1360_v29 = vld [vmem:[%s3008_s0 + $0xb8] sm:$0xff]  ;;  %v176_v31 = vunpack.c.l.b16 %v69_v30  ;;  %v1749_v56 = vld [vmem:[%s3007_s2] ss:$0 sm:$0xff] }
   0xb   :  { %303 = vmatpush.bf16.msra.mxu0 %v1362_v4  ;;  %1366 = vmatpush.bf16.msra.mxu1 %v1362_v4 }
   0xc   :  { %1367 = vmatpush.bf16.msra.mxu2 %v1362_v4  ;;  %1368 = vmatpush.bf16.msra.mxu3 %v1362_v4  ;;  %v201_v32 = vpack.c.b16 %v176_v31, %v176_v31 }
   0xf   :  { %304 = vmatpush.bf16.msra.mxu0 %v1361_v5  ;;  %1369 = vmatpush.bf16.msra.mxu1 %v1361_v5 }
  0x10   :  { %1370 = vmatpush.bf16.msra.mxu2 %v1361_v5  ;;  %1371 = vmatpush.bf16.msra.mxu3 %v1361_v5 }
  0x12   :  { %1312 = vmatmul.msk.bf16.vlgmr.msra.gmra.mxu0 %vm217_vm1, %v1337_v6  ;;  %1318 = vmatmul.msk.bf16.vlgmr.msra.gmra.mxu1 %vm217_vm1, %v1343_v7 }
  0x13   :  { %1325 = vmatmul.msk.bf16.vlgmr.msra.gmra.mxu2 %vm217_vm1, %v1350_v8  ;;  %1332 = vmatmul.msk.bf16.vlgmr.msra.gmra.mxu3 %vm217_vm1, %v1357_v18 }
  0x22   :  { %1313 = vmatmul.msk.bf16.gmra.mxu0 %vm217_vm1, %v1338_v9  ;;  %1319 = vmatmul.msk.bf16.gmra.mxu1 %vm217_vm1, %v1344_v10 }
  0x23   :  { %1326 = vmatmul.msk.bf16.gmra.mxu2 %vm217_vm1, %v1351_v11  ;;  %1333 = vmatmul.msk.bf16.gmra.mxu3 %vm217_vm1, %v1358_v22 }
  0x32   :  { %1314 = vmatmul.msk.bf16.gmra.mxu0 %vm217_vm1, %v1339_v12  ;;  %1320 = vmatmul.msk.bf16.gmra.mxu1 %vm217_vm1, %v1345_v13 }
  0x33   :  { %1327 = vmatmul.msk.bf16.gmra.mxu2 %vm217_vm1, %v1352_v14  ;;  %1334 = vmatmul.msk.bf16.gmra.mxu3 %vm217_vm1, %v1359_v26 }
  0x42   :  { %1315 = vmatmul.msk.bf16.gmra.mxu0 %vm217_vm1, %v1340_v15  ;;  %1321 = vmatmul.msk.bf16.gmra.mxu1 %vm217_vm1, %v1346_v16 }
  0x43   :  { %1328 = vmatmul.msk.bf16.gmra.mxu2 %vm217_vm1, %v1353_v17  ;;  %1335 = vmatmul.msk.bf16.gmra.mxu3 %vm217_vm1, %v1360_v29 }
  0x52   :  { %1316 = vmatmul.msk.bf16.gmra.mxu0 %vm217_vm1, %v1341_v19  ;;  %1322 = vmatmul.msk.bf16.gmra.mxu1 %vm217_vm1, %v1347_v20 }
  0x53   :  { %1329 = vmatmul.msk.bf16.gmra.mxu2 %vm217_vm1, %v1354_v21  ;;  %1336 = vmatmul.msk.bf16.gmra.mxu3 %vm217_vm1, %v201_v32 }
  0x62   :  { %1317 = vmatmul.msk.bf16.gmra.mxu0 %vm217_vm1, %v1342_v23  ;;  %1323 = vmatmul.msk.bf16.gmra.mxu1 %vm217_vm1, %v1348_v24 }
  0x63   :  { %1330 = vmatmul.msk.bf16.gmra.mxu2 %vm217_vm1, %v1355_v25 }
  0x72   :  { %1324 = vmatmul.msk.bf16.gmra.mxu1 %vm217_vm1, %v1349_v27 }
  0x73   :  { %1331 = vmatmul.msk.bf16.gmra.mxu2 %vm217_vm1, %v1356_v28 }
  0x8f   :  { %v306_v33 = vpop.f32.mrf.mxu0  ;;  %v1716_v34 = vpop.f32.mrf.mxu1 }
  0x90   :  { %v1759_v61 = vadd.f32 %v1749_v56, %v306_v33 }
  0x92   :  { %v433_v2 = vsel %vm432_vm2, %v1759_v61, 0.0 }
  0x96   :  { %v1720_v37 = vpop.f32.mrf.mxu2  ;;  %v1742_v54 = vpop.f32.mrf.mxu3 }
  0x97   :  { %v308_v35 = vpop.f32.mrf.mxu0  ;;  %v1718_v36 = vpop.f32.mrf.mxu1 }
  0x98   :  { %v1754_v59 = vadd.f32 %v1749_v56, %v308_v35 }
  0x9a   :  { %v434_v63 = vsel %vm432_vm2, %v1754_v59, 0.0 }
  0x9b   :  { %v435_v5 = vadd.f32 %v434_v63, %v433_v2 }
  0x9e   :  { %v1724_v40 = vpop.f32.mrf.mxu2  ;;  %v1756_v60 = vpop.f32.mrf.mxu3 }
  0x9f   :  { %v311_v38 = vpop.f32.mrf.mxu0  ;;  %v1722_v39 = vpop.f32.mrf.mxu1 }
  0xa0   :  { %v1762_v62 = vadd.f32 %v1749_v56, %v311_v38 }
  0xa2   :  { %v436_v3 = vsel %vm432_vm2, %v1762_v62, 0.0 }
  0xa3   :  { %v437_v10 = vadd.f32 %v436_v3, %v435_v5  ;;  %v1841_v5 = vadd.f32 %v1749_v56, %v1722_v39 }
  0xa6   :  { %v1728_v43 = vpop.f32.mrf.mxu2  ;;  %v1785_v11 = vpop.f32.mrf.mxu3 }
  0xa7   :  { %v313_v41 = vpop.f32.mrf.mxu0  ;;  %v1726_v42 = vpop.f32.mrf.mxu1 }
  0xa8   :  { %v1767_v0 = vadd.f32 %v1749_v56, %v313_v41  ;;  %v1822_v41 = vadd.f32 %v1749_v56, %v1716_v34 }
  0xaa   :  { %v438_v8 = vsel %vm432_vm2, %v1767_v0, 0.0  ;;  %v456_v34 = vsel %vm432_vm2, %v1822_v41, 0.0 }
  0xab   :  { %v439_v14 = vadd.f32 %v438_v8, %v437_v10 }
  0xae   :  { %v1732_v46 = vpop.f32.mrf.mxu2  ;;  %v1809_v27 = vpop.f32.mrf.mxu3 }
  0xaf   :  { %v316_v44 = vpop.f32.mrf.mxu0  ;;  %v1730_v45 = vpop.f32.mrf.mxu1 }
  0xb0   :  { %v1776_v4 = vadd.f32 %v1749_v56, %v316_v44 }
  0xb2   :  { %v440_v12 = vsel %vm432_vm2, %v1776_v4, 0.0 }
  0xb3   :  { %v441_v17 = vadd.f32 %v440_v12, %v439_v14  ;;  %v460_v12 = vsel %vm432_vm2, %v1841_v5, 0.0  ;;  %v1853_v14 = vadd.f32 %v1749_v56, %v1730_v45 }
  0xb6   :  { %v1738_v51 = vpop.f32.mrf.mxu2 }
  0xb7   :  { %v318_v47 = vpop.f32.mrf.mxu0  ;;  %v1734_v48 = vpop.f32.mrf.mxu1 }
  0xb8   :  { %v1783_v9 = vadd.f32 %v1749_v56, %v318_v47 }
  0xba   :  { %v442_v15 = vsel %vm432_vm2, %v1783_v9, 0.0 }
  0xbb   :  { %v443_v20 = vadd.f32 %v442_v15, %v441_v17 }
  0xbe   :  { %v1744_v55 = vpop.f32.mrf.mxu2 }
  0xbf   :  { %v321_v49 = vpop.f32.mrf.mxu0  ;;  %v1736_v50 = vpop.f32.mrf.mxu1 }
  0xc0   :  { %v1790_v13 = vadd.f32 %v1749_v56, %v321_v49 }
  0xc2   :  { %v444_v18 = vsel %vm432_vm2, %v1790_v13, 0.0 }
  0xc3   :  { %v445_v25 = vadd.f32 %v444_v18, %v443_v20  ;;  %v1861_v18 = vadd.f32 %v1749_v56, %v1734_v48 }
  0xc6   :  { %v1769_v1 = vpop.f32.mrf.mxu2 }
  0xc7   :  { %v323_v52 = vpop.f32.mrf.mxu0  ;;  %v1740_v53 = vpop.f32.mrf.mxu1 }
  0xc8   :  { %v1795_v16 = vadd.f32 %v1749_v56, %v323_v52  ;;  %v1829_v52 = vpop.f32.mrf.mxu3 }
  0xca   :  { %v446_v23 = vsel %vm432_vm2, %v1795_v16, 0.0 }
  0xcb   :  { %v447_v30 = vadd.f32 %v446_v23, %v445_v25  ;;  %v1867_v23 = vadd.f32 %v1749_v56, %v1736_v50 }
  0xce   :  { %v1802_v22 = vpop.f32.mrf.mxu2 }
  0xcf   :  { %v326_v57 = vpop.f32.mrf.mxu0  ;;  %v1751_v58 = vpop.f32.mrf.mxu1 }
  0xd0   :  { %v1800_v19 = vadd.f32 %v1749_v56, %v326_v57  ;;  %v1833_v57 = vadd.f32 %v1749_v56, %v1718_v36  ;;  %v1847_v36 = vadd.f32 %v1749_v56, %v1726_v42  ;;  %v1855_v17 = vpop.f32.mrf.mxu3 }
  0xd2   :  { %v448_v28 = vsel %vm432_vm2, %v1800_v19, 0.0  ;;  %v458_v8 = vsel %vm432_vm2, %v1833_v57, 0.0  ;;  %v462_v39 = vsel %vm432_vm2, %v1847_v36, 0.0 }
  0xd3   :  { %v449_v32 = vadd.f32 %v448_v28, %v447_v30  ;;  %v466_v28 = vsel %vm432_vm2, %v1861_v18, 0.0  ;;  %v1873_v30 = vadd.f32 %v1749_v56, %v1740_v53 }
  0xd6   :  { %v1827_v49 = vpop.f32.mrf.mxu2 }
  0xd7   :  { %v328_v6 = vpop.f32.mrf.mxu0  ;;  %v1778_v7 = vpop.f32.mrf.mxu1 }
  0xd8   :  { %v1807_v24 = vadd.f32 %v1749_v56, %v328_v6  ;;  %v1881_v50 = vpop.f32.mrf.mxu3 }
  0xda   :  { %v450_v31 = vsel %vm432_vm2, %v1807_v24, 0.0 }
  0xdb   :  { %v451_v35 = vadd.f32 %v450_v31, %v449_v32  ;;  %v468_v31 = vsel %vm432_vm2, %v1867_v23, 0.0  ;;  %v1879_v32 = vadd.f32 %v1749_v56, %v1751_v58 }
  0xde   :  { %v393_v20 = vpop.f32.mrf.mxu2 }
  0xdf   :  { %v331_v21 = vpop.f32.mrf.mxu0  ;;  %v361_v26 = vpop.f32.mrf.mxu1 }
  0xe0   :  { %v1814_v29 = vadd.f32 %v1749_v56, %v331_v21  ;;  %v464_v21 = vsel %vm432_vm2, %v1853_v14, 0.0 }
  0xe2   :  { %v452_v33 = vsel %vm432_vm2, %v1814_v29, 0.0 }
  0xe3   :  { %v453_v47 = vadd.f32 %v452_v33, %v451_v35  ;;  %v470_v35 = vsel %vm432_vm2, %v1873_v30, 0.0 }
  0xe6   :  { %v396_v58 = vpop.f32.mrf.mxu2 }
  0xe7   :  { %v333_v38 = vpop.f32.mrf.mxu0  ;;  %v363_v3 = vpop.f32.mrf.mxu1 }
  0xe8   :  { %v1825_v44 = vadd.f32 %v1749_v56, %v333_v38  ;;  %v1887_v38 = vadd.f32 %v1749_v56, %v1778_v7 }
  0xea   :  { %v454_v63 = vsel %vm432_vm2, %v1825_v44, 0.0 }
  0xeb   :  { %v455_v2 = vadd.f32 %v454_v63, %v453_v47  ;;  %v472_v47 = vsel %vm432_vm2, %v1879_v32, 0.0  ;;  %v1892_v63 = vadd.f32 %v1749_v56, %v361_v26 }
  0xed   :  { %v457_v6 = vadd.f32 %v456_v34, %v455_v2  ;;  %v474_v34 = vsel %vm432_vm2, %v1887_v38, 0.0  ;;  %v476_v7 = vsel %vm432_vm2, %v1892_v63, 0.0 }
  0xef   :  { %v459_v10 = vadd.f32 %v458_v8, %v457_v6  ;;  %v366_v25 = vpop.f32.mrf.mxu1  ;;  %v1897_v6 = vadd.f32 %v1749_v56, %v363_v3  ;;  %v1913_v3 = vadd.f32 %v1749_v56, %v1720_v37  ;;  %v1927_v37 = vadd.f32 %v1749_v56, %v1728_v43 }
  0xf1   :  { %v461_v15 = vadd.f32 %v460_v12, %v459_v10  ;;  %v1902_v12 = vadd.f32 %v1749_v56, %v366_v25  ;;  %v478_v26 = vsel %vm432_vm2, %v1897_v6, 0.0  ;;  %v1919_v25 = vadd.f32 %v1749_v56, %v1724_v40 }
  0xf2   :  { %v1933_v40 = vadd.f32 %v1749_v56, %v1732_v46 }
  0xf3   :  { %v463_v42 = vadd.f32 %v462_v39, %v461_v15  ;;  %v1904_v39 = vpop.f32.mrf.mxu3 }
  0xf4   :  { %v490_v43 = vsel %vm432_vm2, %v1933_v40, 0.0 }
  0xf5   :  { %v465_v45 = vadd.f32 %v464_v21, %v463_v42 }
  0xf7   :  { %v467_v48 = vadd.f32 %v466_v28, %v465_v45  ;;  %v368_v10 = vpop.f32.mrf.mxu1  ;;  %v480_v45 = vsel %vm432_vm2, %v1902_v12, 0.0 }
  0xf8   :  { %v1909_v42 = vadd.f32 %v1749_v56, %v368_v10  ;;  %v1939_v10 = vadd.f32 %v1749_v56, %v1738_v51 }
  0xf9   :  { %v469_v33 = vadd.f32 %v468_v31, %v467_v48 }
  0xfa   :  { %v482_v48 = vsel %vm432_vm2, %v1909_v42, 0.0  ;;  %v492_v46 = vsel %vm432_vm2, %v1939_v10, 0.0 }
  0xfb   :  { %v471_v53 = vadd.f32 %v470_v35, %v469_v33  ;;  %v398_v33 = vpop.f32.mrf.mxu2  ;;  %v484_v35 = vsel %vm432_vm2, %v1913_v3, 0.0 }
  0xfd   :  { %v473_v2 = vadd.f32 %v472_v47, %v471_v53  ;;  %v426_v47 = vpop.f32.mrf.mxu3 }
  0xff   :  { %v475_v8 = vadd.f32 %v474_v34, %v473_v2  ;;  %v486_v2 = vsel %vm432_vm2, %v1919_v25, 0.0 }
 0x101   :  { %v477_v15 = vadd.f32 %v476_v7, %v475_v8  ;;  %v488_v8 = vsel %vm432_vm2, %v1927_v37, 0.0 }
 0x103   :  { %v479_v21 = vadd.f32 %v478_v26, %v477_v15  ;;  %v1945_v15 = vadd.f32 %v1749_v56, %v1744_v55 }
 0x105   :  { %v481_v28 = vadd.f32 %v480_v45, %v479_v21  ;;  %v1951_v21 = vadd.f32 %v1749_v56, %v1769_v1  ;;  %v428_v51 = vpop.f32.mrf.mxu3 }
 0x107   :  { %v483_v31 = vadd.f32 %v482_v48, %v481_v28  ;;  %v401_v28 = vpop.f32.mrf.mxu2  ;;  %v494_v48 = vsel %vm432_vm2, %v1945_v15, 0.0 }
 0x108   :  { %v1983_v51 = vadd.f32 %v1749_v56, %v401_v28  ;;  %v1998_v28 = vadd.f32 %v1749_v56, %v1756_v60 }
 0x109   :  { %v485_v53 = vadd.f32 %v484_v35, %v483_v31  ;;  %v1957_v31 = vadd.f32 %v1749_v56, %v1802_v22  ;;  %v496_v35 = vsel %vm432_vm2, %v1951_v21, 0.0 }
 0x10b   :  { %v487_v34 = vadd.f32 %v486_v2, %v485_v53  ;;  %v1963_v53 = vadd.f32 %v1749_v56, %v1827_v49  ;;  %v498_v2 = vsel %vm432_vm2, %v1957_v31, 0.0  ;;  %v1978_v49 = vadd.f32 %v1749_v56, %v398_v33 }
 0x10c   :  { %v1992_v33 = vadd.f32 %v1749_v56, %v1742_v54 }
 0x10d   :  { %v489_v7 = vadd.f32 %v488_v8, %v487_v34  ;;  %v1968_v34 = vadd.f32 %v1749_v56, %v393_v20  ;;  %v500_v22 = vsel %vm432_vm2, %v1963_v53, 0.0 }
 0x10f   :  { %v491_v26 = vadd.f32 %v490_v43, %v489_v7  ;;  %v1973_v7 = vadd.f32 %v1749_v56, %v396_v58  ;;  %v506_v58 = vsel %vm432_vm2, %v1978_v49, 0.0 }
 0x111   :  { %v493_v45 = vadd.f32 %v492_v46, %v491_v26  ;;  %v502_v26 = vsel %vm432_vm2, %v1968_v34, 0.0  ;;  %v504_v20 = vsel %vm432_vm2, %v1973_v7, 0.0 }
 0x113   :  { %v495_v55 = vadd.f32 %v494_v48, %v493_v45  ;;  %v403_v45 = vpop.f32.mrf.mxu2 }
 0x115   :  { %v497_v1 = vadd.f32 %v496_v35, %v495_v55  ;;  %v1988_v55 = vadd.f32 %v1749_v56, %v403_v45  ;;  %v2012_v45 = vadd.f32 %v1749_v56, %v1809_v27 }
 0x117   :  { %v499_v8 = vadd.f32 %v498_v2, %v497_v1  ;;  %v508_v1 = vsel %vm432_vm2, %v1983_v51, 0.0 }
 0x119   :  { %v501_v43 = vadd.f32 %v500_v22, %v499_v8  ;;  %v510_v8 = vsel %vm432_vm2, %v1988_v55, 0.0 }
 0x11b   :  { %v503_v46 = vadd.f32 %v502_v26, %v501_v43  ;;  %v512_v43 = vsel %vm432_vm2, %v1992_v33, 0.0  ;;  %v2006_v26 = vadd.f32 %v1749_v56, %v1785_v11  ;;  %v518_v11 = vsel %vm432_vm2, %v2012_v45, 0.0 }
 0x11d   :  { %v505_v48 = vadd.f32 %v504_v20, %v503_v46  ;;  %v514_v46 = vsel %vm432_vm2, %v1998_v28, 0.0  ;;  %v516_v20 = vsel %vm432_vm2, %v2006_v26, 0.0 }
 0x11f   :  { %v507_v35 = vadd.f32 %v506_v58, %v505_v48  ;;  %v2018_v48 = vadd.f32 %v1749_v56, %v1829_v52 }
 0x121   :  { %v509_v2 = vadd.f32 %v508_v1, %v507_v35  ;;  %3021 = vst [vmem:[#allocation2_spill] sm:$0xff] %v2018_v48  ;;  %v2024_v35 = vadd.f32 %v1749_v56, %v1855_v17  ;;  %v520_v27 = vsel %vm432_vm2, %v2018_v48, 0.0 }
 0x123   :  { %v511_v22 = vadd.f32 %v510_v8, %v509_v2  ;;  %3022 = vst [vmem:[#allocation3_spill] sm:$0xff] %v2024_v35  ;;  %v2030_v2 = vadd.f32 %v1749_v56, %v1881_v50  ;;  %v522_v52 = vsel %vm432_vm2, %v2024_v35, 0.0 }
 0x125   :  { %v513_v54 = vadd.f32 %v512_v43, %v511_v22  ;;  %3023 = vst [vmem:[#allocation4_spill] sm:$0xff] %v2030_v2  ;;  %v2036_v22 = vadd.f32 %v1749_v56, %v1904_v39  ;;  %v427_v43 = vadd.f32 %v1749_v56, %v426_v47 }
 0x127   :  { %v515_v60 = vadd.f32 %v514_v46, %v513_v54  ;;  %v524_v54 = vsel %vm432_vm2, %v2030_v2, 0.0  ;;  %v526_v50 = vsel %vm432_vm2, %v2036_v22, 0.0 }
 0x129   :  { %v517_v58 = vadd.f32 %v516_v20, %v515_v60  ;;  %v1576_v60 = vmov 392.0   ;;  %v528_v20 = vsel %vm432_vm2, %v427_v43, 0.0 }
 0x12a   :  { %1376 = vrcp.f32 %v1576_v60 }
 0x12b   :  { %v519_v1 = vadd.f32 %v518_v11, %v517_v58 }
 0x12d   :  { %v521_v8 = vadd.f32 %v520_v27, %v519_v1 }
 0x12f   :  { %v523_v17 = vadd.f32 %v522_v52, %v521_v8 }
 0x130   :  { %v1377_v1 = vpop.eup %1376 }
 0x131   :  { %v525_v46 = vadd.f32 %v524_v54, %v523_v17  ;;  %v537_v35 = vmul.f32 392.0, %v1377_v1  ;;  %vm541_vm3 = vweird.f32 %v1377_v1 }
 0x133   :  { %v527_v58 = vadd.f32 %v526_v50, %v525_v46  ;;  %v538_v56 = vsub.f32 1.0, %v537_v35 }
 0x135   :  { %v529_v11 = vadd.f32 %v528_v20, %v527_v58  ;;  %v539_v8 = vmul.f32 %v1377_v1, %v538_v56 }
 0x137   :  { %v530_v27 = vrot.slane %v529_v11, 4  ;;  %v540_v2 = vadd.f32 %v1377_v1, %v539_v8 }
 0x139   :  { %v531_v39 = vadd.f32 %v530_v27, %v529_v11  ;;  %v2044_v54 = vsel %vm541_vm3, %v1377_v1, %v540_v2 }
 0x13b   :  { %v532_v48 = vrot.slane %v531_v39, 2 }
 0x13d   :  { %v533_v47 = vadd.f32 %v532_v48, %v531_v39 }
 0x13f   :  { %v534_v52 = vrot.slane %v533_v47, 1 }
 0x141   :  { %v535_v17 = vadd.f32 %v534_v52, %v533_v47 }
 0x143   :  { %v2047_v60 = vmul.f32 %v2044_v54, %v535_v17 }
 0x145   :  { %v2050_v46 = vsub.f32 %v427_v43, %v2047_v60  ;;  %v2054_v50 = vsub.f32 %v1759_v61, %v2047_v60  ;;  %v2058_v48 = vsub.f32 %v1754_v59, %v2047_v60  ;;  %v2062_v35 = vsub.f32 %v1762_v62, %v2047_v60 }
 0x146   :  { %v2066_v2 = vsub.f32 %v1767_v0, %v2047_v60  ;;  %v2074_v61 = vsub.f32 %v1776_v4, %v2047_v60  ;;  %v2080_v62 = vsub.f32 %v1783_v9, %v2047_v60  ;;  %v2088_v27 = vsub.f32 %v1790_v13, %v2047_v60 }
 0x147   :  { %3024 = vst [vmem:[#allocation5_spill] sm:$0xff] %v2050_v46  ;;  %v593_v43 = vmul.f32 %v2054_v50, %v2054_v50  ;;  %v594_v20 = vmul.f32 %v2058_v48, %v2058_v48  ;;  %v595_v59 = vmul.f32 %v2062_v35, %v2062_v35  ;;  %v2095_v9 = vsub.f32 %v1795_v16, %v2047_v60 }
 0x148   :  { %v596_v0 = vmul.f32 %v2066_v2, %v2066_v2  ;;  %v597_v4 = vmul.f32 %v2074_v61, %v2074_v61  ;;  %v598_v47 = vmul.f32 %v2080_v62, %v2080_v62  ;;  %v2102_v13 = vsub.f32 %v1800_v19, %v2047_v60 }
 0x149   :  { %v642_v58 = vsel %vm432_vm2, %v593_v43, 0.0  ;;  %v643_v11 = vsel %vm432_vm2, %v594_v20, 0.0  ;;  %v645_v39 = vsel %vm432_vm2, %v595_v59, 0.0  ;;  %v599_v17 = vmul.f32 %v2088_v27, %v2088_v27 }
 0x14a   :  { %v644_v1 = vadd.f32 %v643_v11, %v642_v58  ;;  %v647_v8 = vsel %vm432_vm2, %v596_v0, 0.0  ;;  %v649_v43 = vsel %vm432_vm2, %v597_v4, 0.0  ;;  %v2109_v16 = vsub.f32 %v1807_v24, %v2047_v60 }
 0x14b   :  { %v600_v59 = vmul.f32 %v2095_v9, %v2095_v9  ;;  %v651_v0 = vsel %vm432_vm2, %v598_v47, 0.0  ;;  %v2116_v19 = vsub.f32 %v1814_v29, %v2047_v60  ;;  %v601_v11 = vmul.f32 %v2102_v13, %v2102_v13 }
 0x14c   :  { %v646_v56 = vadd.f32 %v645_v39, %v644_v1  ;;  %v653_v1 = vsel %vm432_vm2, %v599_v17, 0.0  ;;  %v2123_v24 = vsub.f32 %v1825_v44, %v2047_v60  ;;  %v602_v39 = vmul.f32 %v2109_v16, %v2109_v16 }
 0x14d   :  { %v2130_v29 = vsub.f32 %v1822_v41, %v2047_v60  ;;  %v2137_v44 = vsub.f32 %v1833_v57, %v2047_v60  ;;  %v2144_v41 = vsub.f32 %v1841_v5, %v2047_v60  ;;  %v2151_v57 = vsub.f32 %v1847_v36, %v2047_v60 }
 0x14e   :  { %v648_v52 = vadd.f32 %v647_v8, %v646_v56  ;;  %v655_v56 = vsel %vm432_vm2, %v600_v59, 0.0  ;;  %v603_v8 = vmul.f32 %v2116_v19, %v2116_v19  ;;  %v2158_v5 = vsub.f32 %v1853_v14, %v2047_v60 }
 0x14f   :  { %v2165_v36 = vsub.f32 %v1861_v18, %v2047_v60  ;;  %v2172_v14 = vsub.f32 %v1867_v23, %v2047_v60  ;;  %v2179_v18 = vsub.f32 %v1873_v30, %v2047_v60  ;;  %v2186_v23 = vsub.f32 %v1879_v32, %v2047_v60 }
 0x150   :  { %v650_v20 = vadd.f32 %v649_v43, %v648_v52  ;;  %v657_v52 = vsel %vm432_vm2, %v601_v11, 0.0  ;;  %v604_v43 = vmul.f32 %v2123_v24, %v2123_v24  ;;  %v2193_v30 = vsub.f32 %v1887_v38, %v2047_v60 }
 0x151   :  { %v2200_v32 = vsub.f32 %v1892_v63, %v2047_v60  ;;  %v2207_v38 = vsub.f32 %v1897_v6, %v2047_v60  ;;  %v2214_v63 = vsub.f32 %v1902_v12, %v2047_v60  ;;  %v2221_v6 = vsub.f32 %v1909_v42, %v2047_v60 }
 0x152   :  { %v652_v58 = vadd.f32 %v651_v0, %v650_v20  ;;  %v659_v20 = vsel %vm432_vm2, %v602_v39, 0.0  ;;  %v605_v0 = vmul.f32 %v2130_v29, %v2130_v29  ;;  %v2228_v12 = vsub.f32 %v1913_v3, %v2047_v60 }
 0x153   :  { %v2235_v42 = vsub.f32 %v1919_v25, %v2047_v60  ;;  %v2242_v3 = vsub.f32 %v1927_v37, %v2047_v60  ;;  %v2249_v25 = vsub.f32 %v1933_v40, %v2047_v60  ;;  %v2256_v37 = vsub.f32 %v1939_v10, %v2047_v60 }
 0x154   :  { %v654_v4 = vadd.f32 %v653_v1, %v652_v58  ;;  %v661_v58 = vsel %vm432_vm2, %v603_v8, 0.0  ;;  %v606_v1 = vmul.f32 %v2137_v44, %v2137_v44  ;;  %v2263_v40 = vsub.f32 %v1945_v15, %v2047_v60 }
 0x155   :  { %v2270_v10 = vsub.f32 %v1951_v21, %v2047_v60  ;;  %v2277_v15 = vsub.f32 %v1957_v31, %v2047_v60  ;;  %v2284_v21 = vsub.f32 %v1963_v53, %v2047_v60  ;;  %v2291_v31 = vsub.f32 %v1968_v34, %v2047_v60 }
 0x156   :  { %v656_v47 = vadd.f32 %v655_v56, %v654_v4  ;;  %v663_v4 = vsel %vm432_vm2, %v604_v43, 0.0  ;;  %v607_v56 = vmul.f32 %v2144_v41, %v2144_v41  ;;  %v2298_v53 = vsub.f32 %v1973_v7, %v2047_v60 }
 0x157   :  { %v2305_v34 = vsub.f32 %v1978_v49, %v2047_v60  ;;  %v2312_v7 = vsub.f32 %v1983_v51, %v2047_v60  ;;  %v2319_v49 = vsub.f32 %v1988_v55, %v2047_v60  ;;  %v2326_v51 = vsub.f32 %v1992_v33, %v2047_v60 }
 0x158   :  { %v658_v17 = vadd.f32 %v657_v52, %v656_v47  ;;  %v665_v47 = vsel %vm432_vm2, %v605_v0, 0.0  ;;  %v608_v52 = vmul.f32 %v2151_v57, %v2151_v57  ;;  %v2333_v55 = vsub.f32 %v1998_v28, %v2047_v60 }
 0x159   :  { %v2340_v33 = vsub.f32 %v2006_v26, %v2047_v60  ;;  %v2347_v28 = vsub.f32 %v2012_v45, %v2047_v60 }
 0x15a   :  { %v660_v59 = vadd.f32 %v659_v20, %v658_v17  ;;  %v667_v17 = vsel %vm432_vm2, %v606_v1, 0.0  ;;  %v609_v20 = vmul.f32 %v2158_v5, %v2158_v5 }
 0x15b   :  { %3025 = vst [vmem:[#allocation6_spill] sm:$0xff] %v2347_v28 }
 0x15c   :  { %v662_v11 = vadd.f32 %v661_v58, %v660_v59  ;;  %v669_v59 = vsel %vm432_vm2, %v607_v56, 0.0  ;;  %v610_v58 = vmul.f32 %v2165_v36, %v2165_v36 }
 0x15e   :  { %v664_v39 = vadd.f32 %v663_v4, %v662_v11  ;;  %v671_v11 = vsel %vm432_vm2, %v608_v52, 0.0  ;;  %v611_v4 = vmul.f32 %v2172_v14, %v2172_v14 }
 0x160   :  { %v666_v8 = vadd.f32 %v665_v47, %v664_v39  ;;  %v673_v39 = vsel %vm432_vm2, %v609_v20, 0.0  ;;  %v612_v47 = vmul.f32 %v2179_v18, %v2179_v18 }
 0x162   :  { %v668_v43 = vadd.f32 %v667_v17, %v666_v8  ;;  %v675_v8 = vsel %vm432_vm2, %v610_v58, 0.0  ;;  %v613_v17 = vmul.f32 %v2186_v23, %v2186_v23 }
 0x164   :  { %v670_v0 = vadd.f32 %v669_v59, %v668_v43  ;;  %v677_v43 = vsel %vm432_vm2, %v611_v4, 0.0  ;;  %v614_v59 = vmul.f32 %v2193_v30, %v2193_v30 }
 0x166   :  { %v672_v1 = vadd.f32 %v671_v11, %v670_v0  ;;  %v679_v0 = vsel %vm432_vm2, %v612_v47, 0.0  ;;  %v615_v11 = vmul.f32 %v2200_v32, %v2200_v32 }
 0x168   :  { %v674_v56 = vadd.f32 %v673_v39, %v672_v1  ;;  %v681_v1 = vsel %vm432_vm2, %v613_v17, 0.0  ;;  %v616_v39 = vmul.f32 %v2207_v38, %v2207_v38 }
 0x16a   :  { %v676_v52 = vadd.f32 %v675_v8, %v674_v56  ;;  %v683_v56 = vsel %vm432_vm2, %v614_v59, 0.0  ;;  %v617_v8 = vmul.f32 %v2214_v63, %v2214_v63 }
 0x16c   :  { %v678_v20 = vadd.f32 %v677_v43, %v676_v52  ;;  %v685_v52 = vsel %vm432_vm2, %v615_v11, 0.0  ;;  %v618_v43 = vmul.f32 %v2221_v6, %v2221_v6 }
 0x16e   :  { %v680_v58 = vadd.f32 %v679_v0, %v678_v20  ;;  %v687_v20 = vsel %vm432_vm2, %v616_v39, 0.0  ;;  %v619_v0 = vmul.f32 %v2228_v12, %v2228_v12 }
 0x170   :  { %v682_v4 = vadd.f32 %v681_v1, %v680_v58  ;;  %v689_v58 = vsel %vm432_vm2, %v617_v8, 0.0  ;;  %v620_v1 = vmul.f32 %v2235_v42, %v2235_v42 }
 0x172   :  { %v684_v47 = vadd.f32 %v683_v56, %v682_v4  ;;  %v691_v4 = vsel %vm432_vm2, %v618_v43, 0.0  ;;  %v621_v56 = vmul.f32 %v2242_v3, %v2242_v3 }
 0x174   :  { %v686_v17 = vadd.f32 %v685_v52, %v684_v47  ;;  %v693_v47 = vsel %vm432_vm2, %v619_v0, 0.0  ;;  %v622_v52 = vmul.f32 %v2249_v25, %v2249_v25 }
 0x176   :  { %v688_v59 = vadd.f32 %v687_v20, %v686_v17  ;;  %v695_v17 = vsel %vm432_vm2, %v620_v1, 0.0  ;;  %v623_v20 = vmul.f32 %v2256_v37, %v2256_v37 }
 0x178   :  { %v690_v11 = vadd.f32 %v689_v58, %v688_v59  ;;  %v697_v59 = vsel %vm432_vm2, %v621_v56, 0.0  ;;  %v624_v58 = vmul.f32 %v2263_v40, %v2263_v40 }
 0x17a   :  { %v692_v39 = vadd.f32 %v691_v4, %v690_v11  ;;  %v699_v11 = vsel %vm432_vm2, %v622_v52, 0.0  ;;  %v625_v4 = vmul.f32 %v2270_v10, %v2270_v10 }
 0x17c   :  { %v694_v8 = vadd.f32 %v693_v47, %v692_v39  ;;  %v701_v39 = vsel %vm432_vm2, %v623_v20, 0.0  ;;  %v626_v47 = vmul.f32 %v2277_v15, %v2277_v15 }
 0x17e   :  { %v696_v43 = vadd.f32 %v695_v17, %v694_v8  ;;  %v703_v8 = vsel %vm432_vm2, %v624_v58, 0.0  ;;  %v627_v17 = vmul.f32 %v2284_v21, %v2284_v21 }
 0x180   :  { %v698_v0 = vadd.f32 %v697_v59, %v696_v43  ;;  %v705_v43 = vsel %vm432_vm2, %v625_v4, 0.0  ;;  %v628_v59 = vmul.f32 %v2291_v31, %v2291_v31 }
 0x182   :  { %v700_v1 = vadd.f32 %v699_v11, %v698_v0  ;;  %v707_v0 = vsel %vm432_vm2, %v626_v47, 0.0  ;;  %v629_v11 = vmul.f32 %v2298_v53, %v2298_v53 }
 0x184   :  { %v702_v56 = vadd.f32 %v701_v39, %v700_v1  ;;  %v709_v1 = vsel %vm432_vm2, %v627_v17, 0.0  ;;  %v630_v39 = vmul.f32 %v2305_v34, %v2305_v34 }
 0x186   :  { %v704_v52 = vadd.f32 %v703_v8, %v702_v56  ;;  %v711_v56 = vsel %vm432_vm2, %v628_v59, 0.0  ;;  %v631_v8 = vmul.f32 %v2312_v7, %v2312_v7 }
 0x188   :  { %v706_v20 = vadd.f32 %v705_v43, %v704_v52  ;;  %v713_v52 = vsel %vm432_vm2, %v629_v11, 0.0  ;;  %v632_v43 = vmul.f32 %v2319_v49, %v2319_v49 }
 0x18a   :  { %v708_v58 = vadd.f32 %v707_v0, %v706_v20  ;;  %v715_v20 = vsel %vm432_vm2, %v630_v39, 0.0  ;;  %v633_v0 = vmul.f32 %v2326_v51, %v2326_v51 }
 0x18c   :  { %v710_v4 = vadd.f32 %v709_v1, %v708_v58  ;;  %v717_v58 = vsel %vm432_vm2, %v631_v8, 0.0  ;;  %v634_v1 = vmul.f32 %v2333_v55, %v2333_v55  ;;  %v721_v8 = vsel %vm432_vm2, %v633_v0, 0.0 }
 0x18e   :  { %v712_v47 = vadd.f32 %v711_v56, %v710_v4  ;;  %v719_v4 = vsel %vm432_vm2, %v632_v43, 0.0  ;;  %v3026_v56 = vld [vmem:[#allocation2_spill] sm:$0xff]  ;;  %v723_v43 = vsel %vm432_vm2, %v634_v1, 0.0 }
 0x18f   :  { %v2354_v26 = vsub.f32 %v3026_v56, %v2047_v60  ;;  %v2375_v56 = vsub.f32 %v2036_v22, %v2047_v60  ;;  %v641_v22 = vmul.f32 %v2050_v46, %v2050_v46 }
 0x190   :  { %v714_v17 = vadd.f32 %v713_v52, %v712_v47  ;;  %v635_v47 = vmul.f32 %v2340_v33, %v2340_v33 }
 0x191   :  { %3027 = vst [vmem:[#allocation2_spill] sm:$0xff] %v2354_v26 }
 0x192   :  { %v716_v59 = vadd.f32 %v715_v20, %v714_v17  ;;  %v3028_v17 = vld [vmem:[#allocation3_spill] sm:$0xff]  ;;  %v636_v20 = vmul.f32 %v2347_v28, %v2347_v28  ;;  %v725_v0 = vsel %vm432_vm2, %v635_v47, 0.0  ;;  %3032 = vst [vmem:[#allocation7_spill] sm:$0xff] %v2375_v56  ;;  %v640_v47 = vmul.f32 %v2375_v56, %v2375_v56 }
 0x193   :  { %v2361_v45 = vsub.f32 %v3028_v17, %v2047_v60 }
 0x194   :  { %v718_v11 = vadd.f32 %v717_v58, %v716_v59  ;;  %v3030_v58 = vld [vmem:[#allocation4_spill] sm:$0xff]  ;;  %v727_v1 = vsel %vm432_vm2, %v636_v20, 0.0  ;;  %v735_v20 = vsel %vm432_vm2, %v640_v47, 0.0 }
 0x195   :  { %3029 = vst [vmem:[#allocation3_spill] sm:$0xff] %v2361_v45 }
 0x196   :  { %v720_v39 = vadd.f32 %v719_v4, %v718_v11  ;;  %v2368_v11 = vsub.f32 %v3030_v58, %v2047_v60  ;;  %v637_v4 = vmul.f32 %v2354_v26, %v2354_v26 }
 0x198   :  { %v722_v52 = vadd.f32 %v721_v8, %v720_v39  ;;  %3031 = vst [vmem:[#allocation4_spill] sm:$0xff] %v2368_v11  ;;  %v638_v8 = vmul.f32 %v2361_v45, %v2361_v45  ;;  %v639_v17 = vmul.f32 %v2368_v11, %v2368_v11 }
 0x19a   :  { %v724_v59 = vadd.f32 %v723_v43, %v722_v52  ;;  %v729_v43 = vsel %vm432_vm2, %v637_v4, 0.0  ;;  %v733_v60 = vsel %vm432_vm2, %v639_v17, 0.0 }
 0x19c   :  { %v726_v39 = vadd.f32 %v725_v0, %v724_v59  ;;  %v731_v59 = vsel %vm432_vm2, %v638_v8, 0.0 }
 0x19e   :  { %v728_v52 = vadd.f32 %v727_v1, %v726_v39  ;;  %v737_v1 = vsel %vm432_vm2, %v641_v22, 0.0 }
 0x1a0   :  { %v730_v58 = vadd.f32 %v729_v43, %v728_v52 }
 0x1a2   :  { %v732_v0 = vadd.f32 %v731_v59, %v730_v58 }
 0x1a4   :  { %v734_v45 = vadd.f32 %v733_v60, %v732_v0 }
 0x1a6   :  { %v736_v39 = vadd.f32 %v735_v20, %v734_v45 }
 0x1a8   :  { %v738_v11 = vadd.f32 %v737_v1, %v736_v39 }
 0x1aa   :  { %v739_v4 = vrot.slane %v738_v11, 4 }
 0x1ac   :  { %v740_v52 = vadd.f32 %v739_v4, %v738_v11  ;;  %v3033_v4 = vld [vmem:[#allocation6_spill] sm:$0xff] }
 0x1ae   :  { %v741_v43 = vrot.slane %v740_v52, 2 }
 0x1b0   :  { %v742_v26 = vadd.f32 %v741_v43, %v740_v52  ;;  %v3034_v43 = vld [vmem:[#allocation2_spill] sm:$0xff] }
 0x1b2   :  { %v743_v56 = vrot.slane %v742_v26, 1 }
 0x1b4   :  { %v744_v28 = vadd.f32 %v743_v56, %v742_v26 }
 0x1b6   :  { %v745_v8 = vmul.f32 %v744_v28, %v2044_v54 }
 0x1b8   :  { %v746_v58 = vadd.f32 1e-05, %v745_v8  ;;  %v3035_v8 = vld [vmem:[#allocation3_spill] sm:$0xff] }
 0x1ba   :  { %1378 = vrsqrt.f32 %v746_v58  ;;  %vm753_vm5 = vweird.f32 %v746_v58 }
 0x1c0   :  { %v1379_v59 = vpop.eup %1378 }
 0x1c1   :  { %v748_v46 = vmul.f32 %v1379_v59, %v746_v58  ;;  %vm754_vm4 = vweird.f32 %v1379_v59  ;;  %v3036_v58 = vld [vmem:[#allocation4_spill] sm:$0xff] }
 0x1c2   :  { %vm755_vm6 = vmor %vm753_vm5, %vm754_vm4 }
 0x1c3   :  { %v749_v17 = vmul.f32 %v1379_v59, %v748_v46 }
 0x1c5   :  { %v750_v0 = vmul.f32 0.5, %v749_v17 }
 0x1c7   :  { %v751_v60 = vsub.f32 1.5, %v750_v0 }
 0x1c9   :  { %v752_v47 = vmul.f32 %v1379_v59, %v751_v60 }
 0x1cb   :  { %v756_v45 = vsel %vm755_vm6, %v1379_v59, %v752_v47  ;;  %v3037_v59 = vld [vmem:[#allocation7_spill] sm:$0xff] }
 0x1cc   :  { %v757_v11 = vmul.f32 %v756_v45, %v2054_v50  ;;  %v758_v22 = vmul.f32 %v756_v45, %v2058_v48  ;;  %v759_v26 = vmul.f32 %v756_v45, %v2062_v35  ;;  %v760_v54 = vmul.f32 %v756_v45, %v2066_v2 }
 0x1cd   :  { %v761_v28 = vmul.f32 %v756_v45, %v2074_v61  ;;  %v762_v56 = vmul.f32 %v756_v45, %v2080_v62  ;;  %v763_v46 = vmul.f32 %v756_v45, %v2088_v27  ;;  %v764_v20 = vmul.f32 %v756_v45, %v2095_v9 }
 0x1ce   :  { %v765_v39 = vmul.f32 %v756_v45, %v2102_v13  ;;  %v766_v1 = vmul.f32 %v756_v45, %v2109_v16  ;;  %v767_v50 = vmul.f32 %v756_v45, %v2116_v19  ;;  %v768_v48 = vmul.f32 %v756_v45, %v2123_v24 }
 0x1cf   :  { %v769_v35 = vmul.f32 %v756_v45, %v2130_v29  ;;  %v770_v2 = vmul.f32 %v756_v45, %v2137_v44  ;;  %v771_v61 = vmul.f32 %v756_v45, %v2144_v41  ;;  %v772_v62 = vmul.f32 %v756_v45, %v2151_v57 }
 0x1d0   :  { %v773_v27 = vmul.f32 %v756_v45, %v2158_v5  ;;  %v774_v9 = vmul.f32 %v756_v45, %v2165_v36  ;;  %v775_v13 = vmul.f32 %v756_v45, %v2172_v14  ;;  %v776_v16 = vmul.f32 %v756_v45, %v2179_v18 }
 0x1d1   :  { %v777_v19 = vmul.f32 %v756_v45, %v2186_v23  ;;  %v778_v24 = vmul.f32 %v756_v45, %v2193_v30  ;;  %v779_v29 = vmul.f32 %v756_v45, %v2200_v32  ;;  %v780_v44 = vmul.f32 %v756_v45, %v2207_v38 }
 0x1d2   :  { %v781_v41 = vmul.f32 %v756_v45, %v2214_v63  ;;  %v782_v57 = vmul.f32 %v756_v45, %v2221_v6  ;;  %v783_v5 = vmul.f32 %v756_v45, %v2228_v12  ;;  %v784_v36 = vmul.f32 %v756_v45, %v2235_v42  ;;  %v2429_v63 = vld [vmem:[%s3009_s3] ss:$0 sm:$0xff] }
 0x1d3   :  { %v785_v14 = vmul.f32 %v756_v45, %v2242_v3  ;;  %v786_v18 = vmul.f32 %v756_v45, %v2249_v25  ;;  %v787_v23 = vmul.f32 %v756_v45, %v2256_v37  ;;  %v788_v30 = vmul.f32 %v756_v45, %v2263_v40 }
 0x1d4   :  { %v789_v32 = vmul.f32 %v756_v45, %v2270_v10  ;;  %v790_v38 = vmul.f32 %v756_v45, %v2277_v15  ;;  %v791_v6 = vmul.f32 %v756_v45, %v2284_v21  ;;  %v792_v12 = vmul.f32 %v756_v45, %v2291_v31 }
 0x1d5   :  { %v793_v42 = vmul.f32 %v756_v45, %v2298_v53  ;;  %v794_v3 = vmul.f32 %v756_v45, %v2305_v34  ;;  %v795_v25 = vmul.f32 %v756_v45, %v2312_v7  ;;  %v796_v37 = vmul.f32 %v756_v45, %v2319_v49  ;;  %v3038_v7 = vld [vmem:[#allocation5_spill] sm:$0xff] }
 0x1d6   :  { %v797_v40 = vmul.f32 %v756_v45, %v2326_v51  ;;  %v798_v10 = vmul.f32 %v756_v45, %v2333_v55  ;;  %v799_v15 = vmul.f32 %v756_v45, %v2340_v33  ;;  %v800_v52 = vmul.f32 %v756_v45, %v3033_v4 }
 0x1d7   :  { %v801_v21 = vmul.f32 %v756_v45, %v3034_v43  ;;  %v802_v31 = vmul.f32 %v756_v45, %v3035_v8  ;;  %v803_v53 = vmul.f32 %v756_v45, %v3036_v58  ;;  %v2445_v34 = vmul.f32 %v756_v45, %v3037_v59 }
 0x1d8   :  { %v2448_v17 = vmul.f32 %v756_v45, %v3038_v7  ;;  %v809_v49 = vmul.f32 %v2429_v63, %v757_v11  ;;  %v810_v51 = vmul.f32 %v2429_v63, %v758_v22  ;;  %v811_v55 = vmul.f32 %v2429_v63, %v759_v26 }
 0x1d9   :  { %v812_v33 = vmul.f32 %v2429_v63, %v760_v54  ;;  %v813_v0 = vmul.f32 %v2429_v63, %v761_v28  ;;  %v814_v60 = vmul.f32 %v2429_v63, %v762_v56  ;;  %v815_v47 = vmul.f32 %v2429_v63, %v763_v46 }
 0x1da   :  { %v816_v4 = vmul.f32 %v2429_v63, %v764_v20  ;;  %v817_v43 = vmul.f32 %v2429_v63, %v765_v39  ;;  %v818_v45 = vmul.f32 %v2429_v63, %v766_v1  ;;  %v819_v11 = vmul.f32 %v2429_v63, %v767_v50 }
 0x1db   :  { %v820_v22 = vmul.f32 %v2429_v63, %v768_v48  ;;  %v821_v26 = vmul.f32 %v2429_v63, %v769_v35  ;;  %v2464_v54 = vmul.f32 %v2429_v63, %v770_v2  ;;  %v2467_v28 = vmul.f32 %v2429_v63, %v771_v61  ;;  %v2490_v48 = vld [vmem:[%s3010_s4] ss:$0 sm:$0xff] }
 0x1dc   :  { %v2470_v56 = vmul.f32 %v2429_v63, %v772_v62  ;;  %v2473_v46 = vmul.f32 %v2429_v63, %v773_v27  ;;  %v2476_v20 = vmul.f32 %v2429_v63, %v774_v9  ;;  %v2479_v39 = vmul.f32 %v2429_v63, %v775_v13 }
 0x1dd   :  { %v2482_v1 = vmul.f32 %v2429_v63, %v776_v16  ;;  %v2485_v50 = vmul.f32 %v2429_v63, %v777_v19  ;;  %v2493_v35 = vmul.f32 %v2429_v63, %v778_v24  ;;  %v2496_v2 = vmul.f32 %v2429_v63, %v779_v29 }
 0x1de   :  { %v2499_v61 = vmul.f32 %v2429_v63, %v780_v44  ;;  %v2502_v62 = vmul.f32 %v2429_v63, %v781_v41  ;;  %v2505_v27 = vmul.f32 %v2429_v63, %v782_v57  ;;  %v2508_v9 = vmul.f32 %v2429_v63, %v783_v5 }
 0x1df   :  { %v2511_v13 = vmul.f32 %v2429_v63, %v784_v36  ;;  %v2514_v16 = vmul.f32 %v2429_v63, %v785_v14  ;;  %v2517_v19 = vmul.f32 %v2429_v63, %v786_v18  ;;  %v2520_v24 = vmul.f32 %v2429_v63, %v787_v23 }
 0x1e0   :  { %v2523_v29 = vmul.f32 %v2429_v63, %v788_v30  ;;  %v2526_v44 = vmul.f32 %v2429_v63, %v789_v32  ;;  %v2529_v41 = vmul.f32 %v2429_v63, %v790_v38  ;;  %v861_v57 = vadd.f32 %v2490_v48, %v809_v49 }
 0x1e1   :  { %v862_v5 = vadd.f32 %v2490_v48, %v810_v51  ;;  %v863_v36 = vadd.f32 %v2490_v48, %v811_v55  ;;  %v2535_v14 = vmul.f32 %v2429_v63, %v791_v6  ;;  %v2538_v18 = vmul.f32 %v2429_v63, %v792_v12 }
 0x1e2   :  { %v2541_v23 = vmul.f32 %v2429_v63, %v793_v42  ;;  %v864_v30 = vadd.f32 %v2490_v48, %v812_v33  ;;  %v2545_v32 = vmul.f32 %v2429_v63, %v794_v3  ;;  %v2548_v38 = vmul.f32 %v2429_v63, %v795_v25 }
 0x1e3   :  { %v2551_v8 = vmul.f32 %v2429_v63, %v796_v37  ;;  %v865_v6 = vadd.f32 %v2490_v48, %v813_v0  ;;  %v2555_v58 = vmul.f32 %v2429_v63, %v797_v40  ;;  %v2558_v12 = vmul.f32 %v2429_v63, %v798_v10 }
 0x1e4   :  { %v866_v42 = vadd.f32 %v2490_v48, %v814_v60  ;;  %v867_v59 = vadd.f32 %v2490_v48, %v815_v47  ;;  %v2563_v3 = vmul.f32 %v2429_v63, %v799_v15  ;;  %v910_v25 = vsub.f32 0.0, %v861_v57 }
 0x1e5   :  { %v911_v7 = vsub.f32 0.0, %v862_v5  ;;  %v912_v49 = vsub.f32 0.0, %v863_v36  ;;  %v2566_v37 = vmul.f32 %v2429_v63, %v800_v52  ;;  %v2569_v51 = vmul.f32 %v2429_v63, %v801_v21 }
 0x1e6   :  { %v868_v40 = vadd.f32 %v2490_v48, %v816_v4  ;;  %v913_v10 = vsub.f32 0.0, %v864_v30  ;;  %v2573_v55 = vmul.f32 %v2429_v63, %v802_v31  ;;  %v2576_v33 = vmul.f32 %v2429_v63, %v803_v53 }
 0x1e7   :  { %v869_v15 = vadd.f32 %v2490_v48, %v817_v43  ;;  %v914_v0 = vsub.f32 0.0, %v865_v6  ;;  %v2581_v60 = vmul.f32 %v2429_v63, %v2445_v34  ;;  %v870_v52 = vadd.f32 %v2490_v48, %v818_v45 }
 0x1e8   :  { %v915_v21 = vsub.f32 0.0, %v866_v42  ;;  %v916_v47 = vsub.f32 0.0, %v867_v59  ;;  %v871_v4 = vadd.f32 %v2490_v48, %v819_v11  ;;  %v959_v57 = vmul.f32 1.442695, %v910_v25 }
 0x1e9   :  { %v961_v5 = vmul.f32 1.442695, %v911_v7  ;;  %v963_v31 = vmul.f32 1.442695, %v912_v49  ;;  %v2587_v53 = vmul.f32 %v2429_v63, %v2448_v17  ;;  %v872_v43 = vadd.f32 %v2490_v48, %v820_v22 }
 0x1ea   :  { %v917_v36 = vsub.f32 0.0, %v868_v40  ;;  %v965_v30 = vmul.f32 1.442695, %v913_v10  ;;  %v873_v34 = vadd.f32 %v2490_v48, %v821_v26  ;;  %v918_v6 = vsub.f32 0.0, %v869_v15 }
 0x1eb   :  { %1380 = vpow2.f32 %v959_v57  ;;  %v967_v45 = vmul.f32 1.442695, %v914_v0  ;;  %v874_v42 = vadd.f32 %v2490_v48, %v2464_v54  ;;  %v919_v11 = vsub.f32 0.0, %v870_v52 }
 0x1ec   :  { %1382 = vpow2.f32 %v961_v5  ;;  %v969_v59 = vmul.f32 1.442695, %v915_v21  ;;  %v875_v25 = vadd.f32 %v2490_v48, %v2467_v28  ;;  %v920_v63 = vsub.f32 0.0, %v871_v4 }
 0x1ed   :  { %1384 = vpow2.f32 %v963_v31  ;;  %v971_v17 = vmul.f32 1.442695, %v916_v47  ;;  %v876_v22 = vadd.f32 %v2490_v48, %v2470_v56  ;;  %v921_v7 = vsub.f32 0.0, %v872_v43 }
 0x1ee   :  { %1386 = vpow2.f32 %v965_v30  ;;  %v973_v26 = vmul.f32 1.442695, %v917_v36  ;;  %v877_v49 = vadd.f32 %v2490_v48, %v2473_v46  ;;  %v922_v40 = vsub.f32 0.0, %v873_v34 }
 0x1ef   :  { %1388 = vpow2.f32 %v967_v45  ;;  %v975_v54 = vmul.f32 1.442695, %v918_v6  ;;  %v878_v10 = vadd.f32 %v2490_v48, %v2476_v20  ;;  %v923_v15 = vsub.f32 0.0, %v874_v42 }
 0x1f0   :  { %1390 = vpow2.f32 %v969_v59  ;;  %v977_v28 = vmul.f32 1.442695, %v919_v11  ;;  %v879_v56 = vadd.f32 %v2490_v48, %v2479_v39  ;;  %v924_v52 = vsub.f32 0.0, %v875_v25 }
 0x1f1   :  { %v2601_v0 = vpop.eup %1380  ;;  %1392 = vpow2.f32 %v971_v17  ;;  %v979_v21 = vmul.f32 1.442695, %v920_v63  ;;  %v880_v46 = vadd.f32 %v2490_v48, %v2482_v1  ;;  %v925_v4 = vsub.f32 0.0, %v876_v22 }
 0x1f2   :  { %v2605_v47 = vpop.eup %1382  ;;  %1394 = vpow2.f32 %v973_v26  ;;  %v981_v57 = vmul.f32 1.442695, %v921_v7  ;;  %v881_v5 = vadd.f32 %v2490_v48, %v2485_v50  ;;  %v926_v31 = vsub.f32 0.0, %v877_v49 }
 0x1f3   :  { %v2609_v20 = vpop.eup %1384  ;;  %1396 = vpow2.f32 %v975_v54  ;;  %v983_v43 = vmul.f32 1.442695, %v922_v40  ;;  %v882_v36 = vadd.f32 %v2490_v48, %v2493_v35  ;;  %v927_v30 = vsub.f32 0.0, %v878_v10 }
 0x1f4   :  { %v2613_v39 = vpop.eup %1386  ;;  %1398 = vpow2.f32 %v977_v28  ;;  %v985_v34 = vmul.f32 1.442695, %v923_v15  ;;  %v883_v6 = vadd.f32 %v2490_v48, %v2496_v2  ;;  %v928_v45 = vsub.f32 0.0, %v879_v56 }
 0x1f5   :  { %v2617_v1 = vpop.eup %1388  ;;  %1400 = vpow2.f32 %v979_v21  ;;  %v987_v42 = vmul.f32 1.442695, %v924_v52  ;;  %v884_v11 = vadd.f32 %v2490_v48, %v2499_v61  ;;  %v929_v59 = vsub.f32 0.0, %v880_v46 }
 0x1f6   :  { %v2621_v50 = vpop.eup %1390  ;;  %1402 = vpow2.f32 %v981_v57  ;;  %v989_v25 = vmul.f32 1.442695, %v925_v4  ;;  %v885_v63 = vadd.f32 %v2490_v48, %v2502_v62  ;;  %v930_v17 = vsub.f32 0.0, %v881_v5 }
 0x1f7   :  { %v2625_v35 = vpop.eup %1392  ;;  %1404 = vpow2.f32 %v983_v43  ;;  %v991_v22 = vmul.f32 1.442695, %v926_v31  ;;  %v886_v7 = vadd.f32 %v2490_v48, %v2505_v27  ;;  %v931_v26 = vsub.f32 0.0, %v882_v36 }
 0x1f8   :  { %v2629_v2 = vpop.eup %1394  ;;  %1406 = vpow2.f32 %v985_v34  ;;  %v993_v49 = vmul.f32 1.442695, %v927_v30  ;;  %v887_v40 = vadd.f32 %v2490_v48, %v2508_v9  ;;  %v932_v54 = vsub.f32 0.0, %v883_v6 }
 0x1f9   :  { %v2633_v61 = vpop.eup %1396  ;;  %1408 = vpow2.f32 %v987_v42  ;;  %v995_v10 = vmul.f32 1.442695, %v928_v45  ;;  %v888_v15 = vadd.f32 %v2490_v48, %v2511_v13  ;;  %v933_v28 = vsub.f32 0.0, %v884_v11 }
 0x1fa   :  { %v2637_v62 = vpop.eup %1398  ;;  %1410 = vpow2.f32 %v989_v25  ;;  %v997_v56 = vmul.f32 1.442695, %v929_v59  ;;  %v889_v52 = vadd.f32 %v2490_v48, %v2514_v16  ;;  %v934_v21 = vsub.f32 0.0, %v885_v63 }
 0x1fb   :  { %v2641_v27 = vpop.eup %1400  ;;  %1412 = vpow2.f32 %v991_v22  ;;  %v999_v46 = vmul.f32 1.442695, %v930_v17  ;;  %v890_v4 = vadd.f32 %v2490_v48, %v2517_v19  ;;  %v935_v57 = vsub.f32 0.0, %v886_v7 }
 0x1fc   :  { %v2645_v9 = vpop.eup %1402  ;;  %1414 = vpow2.f32 %v993_v49  ;;  %v1001_v5 = vmul.f32 1.442695, %v931_v26  ;;  %v891_v31 = vadd.f32 %v2490_v48, %v2520_v24  ;;  %v936_v43 = vsub.f32 0.0, %v887_v40 }
 0x1fd   :  { %v2649_v13 = vpop.eup %1404  ;;  %1416 = vpow2.f32 %v995_v10  ;;  %v1003_v36 = vmul.f32 1.442695, %v932_v54  ;;  %v892_v30 = vadd.f32 %v2490_v48, %v2523_v29  ;;  %v937_v34 = vsub.f32 0.0, %v888_v15 }
 0x1fe   :  { %v2653_v16 = vpop.eup %1406  ;;  %1418 = vpow2.f32 %v997_v56  ;;  %v1005_v6 = vmul.f32 1.442695, %v933_v28  ;;  %v893_v45 = vadd.f32 %v2490_v48, %v2526_v44  ;;  %v938_v42 = vsub.f32 0.0, %v889_v52 }
 0x1ff   :  { %v2657_v19 = vpop.eup %1408  ;;  %1420 = vpow2.f32 %v999_v46  ;;  %v1007_v11 = vmul.f32 1.442695, %v934_v21  ;;  %v894_v59 = vadd.f32 %v2490_v48, %v2529_v41  ;;  %v939_v25 = vsub.f32 0.0, %v890_v4 }
 0x200   :  { %v2661_v24 = vpop.eup %1410  ;;  %1422 = vpow2.f32 %v1001_v5  ;;  %v1009_v63 = vmul.f32 1.442695, %v935_v57  ;;  %v895_v17 = vadd.f32 %v2490_v48, %v2535_v14  ;;  %v940_v22 = vsub.f32 0.0, %v891_v31 }
 0x201   :  { %v2665_v29 = vpop.eup %1412  ;;  %1424 = vpow2.f32 %v1003_v36  ;;  %v1011_v7 = vmul.f32 1.442695, %v936_v43  ;;  %v896_v26 = vadd.f32 %v2490_v48, %v2538_v18  ;;  %v941_v49 = vsub.f32 0.0, %v892_v30 }
 0x202   :  { %v2669_v44 = vpop.eup %1414  ;;  %1426 = vpow2.f32 %v1005_v6  ;;  %v1013_v40 = vmul.f32 1.442695, %v937_v34  ;;  %v897_v54 = vadd.f32 %v2490_v48, %v2541_v23  ;;  %v942_v10 = vsub.f32 0.0, %v893_v45 }
 0x203   :  { %v2673_v41 = vpop.eup %1416  ;;  %1428 = vpow2.f32 %v1007_v11  ;;  %v1015_v15 = vmul.f32 1.442695, %v938_v42  ;;  %v898_v28 = vadd.f32 %v2490_v48, %v2545_v32  ;;  %v943_v56 = vsub.f32 0.0, %v894_v59 }
 0x204   :  { %v2677_v14 = vpop.eup %1418  ;;  %1430 = vpow2.f32 %v1009_v63  ;;  %v1017_v52 = vmul.f32 1.442695, %v939_v25  ;;  %v899_v21 = vadd.f32 %v2490_v48, %v2548_v38  ;;  %v944_v46 = vsub.f32 0.0, %v895_v17 }
 0x205   :  { %v2681_v18 = vpop.eup %1420  ;;  %1432 = vpow2.f32 %v1011_v7  ;;  %v1019_v4 = vmul.f32 1.442695, %v940_v22  ;;  %v900_v57 = vadd.f32 %v2490_v48, %v2551_v8  ;;  %v945_v5 = vsub.f32 0.0, %v896_v26 }
 0x206   :  { %v2685_v23 = vpop.eup %1422  ;;  %1434 = vpow2.f32 %v1013_v40  ;;  %v1021_v31 = vmul.f32 1.442695, %v941_v49  ;;  %v901_v43 = vadd.f32 %v2490_v48, %v2555_v58  ;;  %v946_v36 = vsub.f32 0.0, %v897_v54 }
 0x207   :  { %v2689_v32 = vpop.eup %1424  ;;  %1436 = vpow2.f32 %v1015_v15  ;;  %v1023_v30 = vmul.f32 1.442695, %v942_v10  ;;  %v902_v34 = vadd.f32 %v2490_v48, %v2558_v12  ;;  %v947_v6 = vsub.f32 0.0, %v898_v28 }
 0x208   :  { %v2693_v38 = vpop.eup %1426  ;;  %1438 = vpow2.f32 %v1017_v52  ;;  %v1025_v45 = vmul.f32 1.442695, %v943_v56  ;;  %v903_v42 = vadd.f32 %v2490_v48, %v2563_v3  ;;  %v948_v11 = vsub.f32 0.0, %v899_v21 }
 0x209   :  { %v2697_v8 = vpop.eup %1428  ;;  %1440 = vpow2.f32 %v1019_v4  ;;  %v1027_v59 = vmul.f32 1.442695, %v944_v46  ;;  %v904_v25 = vadd.f32 %v2490_v48, %v2566_v37  ;;  %v949_v63 = vsub.f32 0.0, %v900_v57 }
 0x20a   :  { %v2701_v58 = vpop.eup %1430  ;;  %1442 = vpow2.f32 %v1021_v31  ;;  %v1029_v17 = vmul.f32 1.442695, %v945_v5  ;;  %v905_v22 = vadd.f32 %v2490_v48, %v2569_v51  ;;  %v950_v7 = vsub.f32 0.0, %v901_v43 }
 0x20b   :  { %v2705_v12 = vpop.eup %1432  ;;  %1444 = vpow2.f32 %v1023_v30  ;;  %v1031_v26 = vmul.f32 1.442695, %v946_v36  ;;  %v906_v49 = vadd.f32 %v2490_v48, %v2573_v55  ;;  %v951_v40 = vsub.f32 0.0, %v902_v34 }
 0x20c   :  { %v2709_v3 = vpop.eup %1434  ;;  %1446 = vpow2.f32 %v1025_v45  ;;  %v1033_v54 = vmul.f32 1.442695, %v947_v6  ;;  %v907_v10 = vadd.f32 %v2490_v48, %v2576_v33  ;;  %v952_v15 = vsub.f32 0.0, %v903_v42 }
 0x20d   :  { %v2713_v37 = vpop.eup %1436  ;;  %1448 = vpow2.f32 %v1027_v59  ;;  %v1035_v28 = vmul.f32 1.442695, %v948_v11  ;;  %v908_v56 = vadd.f32 %v2490_v48, %v2581_v60  ;;  %v953_v52 = vsub.f32 0.0, %v904_v25 }
 0x20e   :  { %v2717_v51 = vpop.eup %1438  ;;  %1450 = vpow2.f32 %v1029_v17  ;;  %v1037_v21 = vmul.f32 1.442695, %v949_v63  ;;  %v909_v46 = vadd.f32 %v2490_v48, %v2587_v53  ;;  %v954_v4 = vsub.f32 0.0, %v905_v22 }
 0x20f   :  { %v2721_v55 = vpop.eup %1440  ;;  %1452 = vpow2.f32 %v1031_v26  ;;  %v1039_v57 = vmul.f32 1.442695, %v950_v7  ;;  %v955_v5 = vsub.f32 0.0, %v906_v49  ;;  %v1041_v31 = vmul.f32 1.442695, %v951_v40 }
 0x210   :  { %v2725_v33 = vpop.eup %1442  ;;  %1454 = vpow2.f32 %v1033_v54  ;;  %v956_v36 = vsub.f32 0.0, %v907_v10  ;;  %v1043_v60 = vmul.f32 1.442695, %v952_v15  ;;  %v957_v34 = vsub.f32 0.0, %v908_v56 }
 0x211   :  { %v2727_v43 = vpop.eup %1444  ;;  %1456 = vpow2.f32 %v1035_v28  ;;  %v1045_v6 = vmul.f32 1.442695, %v953_v52  ;;  %v958_v48 = vsub.f32 0.0, %v909_v46  ;;  %v1047_v53 = vmul.f32 1.442695, %v954_v4 }
 0x212   :  { %v2729_v30 = vpop.eup %1446  ;;  %1458 = vpow2.f32 %v1037_v21  ;;  %v1049_v11 = vmul.f32 1.442695, %v955_v5  ;;  %v1051_v25 = vmul.f32 1.442695, %v956_v36  ;;  %v1053_v17 = vmul.f32 1.442695, %v957_v34 }
 0x213   :  { %v2731_v45 = vpop.eup %1448  ;;  %1460 = vpow2.f32 %v1039_v57  ;;  %v1055_v7 = vmul.f32 1.442695, %v958_v48  ;;  %v1057_v49 = vadd.f32 1.0, %v2601_v0  ;;  %v1058_v54 = vadd.f32 1.0, %v2605_v47 }
 0x214   :  { %v2733_v42 = vpop.eup %1450  ;;  %1462 = vpow2.f32 %v1041_v31  ;;  %v1059_v15 = vadd.f32 1.0, %v2609_v20  ;;  %v1060_v56 = vadd.f32 1.0, %v2613_v39  ;;  %v1061_v21 = vadd.f32 1.0, %v2617_v1 }
 0x215   :  { %v2735_v59 = vpop.eup %1452  ;;  %1464 = vpow2.f32 %v1043_v60  ;;  %v1062_v46 = vadd.f32 1.0, %v2621_v50  ;;  %v1063_v4 = vadd.f32 1.0, %v2625_v35  ;;  %v1064_v57 = vadd.f32 1.0, %v2629_v2 }
 0x216   :  { %v2737_v63 = vpop.eup %1454  ;;  %1466 = vpow2.f32 %v1045_v6  ;;  %v1065_v1 = vadd.f32 1.0, %v2633_v61  ;;  %v1066_v50 = vadd.f32 1.0, %v2637_v62  ;;  %v1067_v36 = vadd.f32 1.0, %v2641_v27 }
 0x217   :  { %v2739_v22 = vpop.eup %1456  ;;  %1468 = vpow2.f32 %v1047_v53  ;;  %v1068_v60 = vadd.f32 1.0, %v2645_v9  ;;  %v1069_v61 = vadd.f32 1.0, %v2649_v13  ;;  %v1070_v27 = vadd.f32 1.0, %v2653_v16 }
 0x218   :  { %v2741_v26 = vpop.eup %1458  ;;  %1470 = vpow2.f32 %v1049_v11  ;;  %v1071_v34 = vadd.f32 1.0, %v2657_v19  ;;  %v1072_v6 = vadd.f32 1.0, %v2661_v24  ;;  %v1073_v48 = vadd.f32 1.0, %v2665_v29 }
 0x219   :  { %v2744_v40 = vpop.eup %1460  ;;  %1472 = vpow2.f32 %v1051_v25  ;;  %v1074_v53 = vadd.f32 1.0, %v2669_v44  ;;  %v1075_v11 = vadd.f32 1.0, %v2673_v41  ;;  %v1076_v25 = vadd.f32 1.0, %v2677_v14 }
 0x21a   :  { %v2747_v10 = vpop.eup %1462  ;;  %1474 = vpow2.f32 %v1053_v17  ;;  %v1077_v17 = vadd.f32 1.0, %v2681_v18 }
 0x21b   :  { %v2750_v28 = vpop.eup %1464  ;;  %1476 = vpow2.f32 %v1055_v7  ;;  %v1078_v7 = vadd.f32 1.0, %v2685_v23 }
 0x21c   :  { %v2753_v52 = vpop.eup %1466  ;;  %1478 = vrcp.f32 %v1057_v49  ;;  %v1079_v49 = vadd.f32 1.0, %v2689_v32 }
 0x21d   :  { %v2756_v0 = vpop.eup %1468  ;;  %1480 = vrcp.f32 %v1058_v54  ;;  %v1080_v54 = vadd.f32 1.0, %v2693_v38 }
 0x21e   :  { %v2759_v47 = vpop.eup %1470  ;;  %1482 = vrcp.f32 %v1059_v15  ;;  %v1081_v15 = vadd.f32 1.0, %v2697_v8 }
 0x21f   :  { %v2762_v20 = vpop.eup %1472  ;;  %1484 = vrcp.f32 %v1060_v56  ;;  %v1082_v56 = vadd.f32 1.0, %v2701_v58 }
 0x220   :  { %v2765_v39 = vpop.eup %1474  ;;  %1486 = vrcp.f32 %v1061_v21  ;;  %v1083_v21 = vadd.f32 1.0, %v2705_v12 }
 0x221   :  { %v2768_v5 = vpop.eup %1476  ;;  %1488 = vrcp.f32 %v1062_v46  ;;  %v1084_v46 = vadd.f32 1.0, %v2709_v3 }
 0x222   :  { %v1479_v31 = vpop.eup %1478  ;;  %1490 = vrcp.f32 %v1063_v4  ;;  %v1085_v4 = vadd.f32 1.0, %v2713_v37 }
 0x223   :  { %v1481_v35 = vpop.eup %1480  ;;  %1492 = vrcp.f32 %v1064_v57  ;;  %1155 = vst.msk [vmem:[%s3011_s5] sm:$0xff] %vm432_vm2, %v1479_v31  ;;  %v1086_v57 = vadd.f32 1.0, %v2717_v51  ;;  %v1089_v31 = vadd.f32 1.0, %v2727_v43 }
 0x224   :  { %v1483_v2 = vpop.eup %1482  ;;  %1494 = vrcp.f32 %v1065_v1  ;;  %1156 = vst.msk [vmem:[%s3011_s5 + $0x8] sm:$0xff] %vm432_vm2, %v1481_v35  ;;  %v1087_v1 = vadd.f32 1.0, %v2721_v55  ;;  %v1091_v35 = vadd.f32 1.0, %v2731_v45 }
 0x225   :  { %v1485_v62 = vpop.eup %1484  ;;  %1496 = vrcp.f32 %v1066_v50  ;;  %1157 = vst.msk [vmem:[%s3011_s5 + $0x10] sm:$0xff] %vm432_vm2, %v1483_v2  ;;  %v1088_v50 = vadd.f32 1.0, %v2725_v33  ;;  %v1093_v2 = vadd.f32 1.0, %v2735_v59 }
 0x226   :  { %v1487_v9 = vpop.eup %1486  ;;  %1498 = vrcp.f32 %v1067_v36  ;;  %1158 = vst.msk [vmem:[%s3011_s5 + $0x18] sm:$0xff] %vm432_vm2, %v1485_v62  ;;  %v1090_v36 = vadd.f32 1.0, %v2729_v30  ;;  %v1095_v62 = vadd.f32 1.0, %v2739_v22 }
 0x227   :  { %v1489_v13 = vpop.eup %1488  ;;  %1500 = vrcp.f32 %v1068_v60  ;;  %1159 = vst.msk [vmem:[%s3011_s5 + $0x20] sm:$0xff] %vm432_vm2, %v1487_v9  ;;  %v1092_v60 = vadd.f32 1.0, %v2733_v42  ;;  %v1097_v9 = vadd.f32 1.0, %v2744_v40 }
 0x228   :  { %v1491_v16 = vpop.eup %1490  ;;  %1502 = vrcp.f32 %v1069_v61  ;;  %1160 = vst.msk [vmem:[%s3011_s5 + $0x28] sm:$0xff] %vm432_vm2, %v1489_v13  ;;  %v1094_v61 = vadd.f32 1.0, %v2737_v63  ;;  %v1099_v13 = vadd.f32 1.0, %v2750_v28 }
 0x229   :  { %v1493_v19 = vpop.eup %1492  ;;  %1504 = vrcp.f32 %v1070_v27  ;;  %1161 = vst.msk [vmem:[%s3011_s5 + $0x30] sm:$0xff] %vm432_vm2, %v1491_v16  ;;  %v1096_v27 = vadd.f32 1.0, %v2741_v26  ;;  %v1101_v16 = vadd.f32 1.0, %v2756_v0 }
 0x22a   :  { %v1495_v24 = vpop.eup %1494  ;;  %1506 = vrcp.f32 %v1071_v34  ;;  %1162 = vst.msk [vmem:[%s3011_s5 + $0x38] sm:$0xff] %vm432_vm2, %v1493_v19  ;;  %v1098_v34 = vadd.f32 1.0, %v2747_v10  ;;  %v1103_v19 = vadd.f32 1.0, %v2762_v20 }
 0x22b   :  { %v1497_v29 = vpop.eup %1496  ;;  %1508 = vrcp.f32 %v1072_v6  ;;  %1163 = vst.msk [vmem:[%s3011_s5 + $0x40] sm:$0xff] %vm432_vm2, %v1495_v24  ;;  %v1100_v6 = vadd.f32 1.0, %v2753_v52  ;;  %v1105_v24 = vadd.f32 1.0, %v2768_v5 }
 0x22c   :  { %v1499_v44 = vpop.eup %1498  ;;  %1510 = vrcp.f32 %v1073_v48  ;;  %1164 = vst.msk [vmem:[%s3011_s5 + $0x48] sm:$0xff] %vm432_vm2, %v1497_v29  ;;  %v1102_v48 = vadd.f32 1.0, %v2759_v47 }
 0x22d   :  { %v1501_v41 = vpop.eup %1500  ;;  %1512 = vrcp.f32 %v1074_v53  ;;  %1165 = vst.msk [vmem:[%s3011_s5 + $0x50] sm:$0xff] %vm432_vm2, %v1499_v44  ;;  %v1104_v53 = vadd.f32 1.0, %v2765_v39 }
 0x22e   :  { %v1503_v14 = vpop.eup %1502  ;;  %1514 = vrcp.f32 %v1075_v11  ;;  %1166 = vst.msk [vmem:[%s3011_s5 + $0x58] sm:$0xff] %vm432_vm2, %v1501_v41 }
 0x22f   :  { %v1505_v18 = vpop.eup %1504  ;;  %1516 = vrcp.f32 %v1076_v25  ;;  %1167 = vst.msk [vmem:[%s3011_s5 + $0x60] sm:$0xff] %vm432_vm2, %v1503_v14 }
 0x230   :  { %v1507_v23 = vpop.eup %1506  ;;  %1518 = vrcp.f32 %v1077_v17  ;;  %1168 = vst.msk [vmem:[%s3011_s5 + $0x68] sm:$0xff] %vm432_vm2, %v1505_v18 }
 0x231   :  { %v1509_v32 = vpop.eup %1508  ;;  %1520 = vrcp.f32 %v1078_v7  ;;  %1169 = vst.msk [vmem:[%s3011_s5 + $0x70] sm:$0xff] %vm432_vm2, %v1507_v23 }
 0x232   :  { %v1511_v38 = vpop.eup %1510  ;;  %1522 = vrcp.f32 %v1079_v49  ;;  %1170 = vst.msk [vmem:[%s3011_s5 + $0x78] sm:$0xff] %vm432_vm2, %v1509_v32 }
 0x233   :  { %v1513_v8 = vpop.eup %1512  ;;  %1524 = vrcp.f32 %v1080_v54  ;;  %1171 = vst.msk [vmem:[%s3011_s5 + $0x80] sm:$0xff] %vm432_vm2, %v1511_v38 }
 0x234   :  { %v1515_v58 = vpop.eup %1514  ;;  %1526 = vrcp.f32 %v1081_v15  ;;  %1172 = vst.msk [vmem:[%s3011_s5 + $0x88] sm:$0xff] %vm432_vm2, %v1513_v8 }
 0x235   :  { %v1517_v12 = vpop.eup %1516  ;;  %1528 = vrcp.f32 %v1082_v56  ;;  %1173 = vst.msk [vmem:[%s3011_s5 + $0x90] sm:$0xff] %vm432_vm2, %v1515_v58 }
 0x236   :  { %v1519_v3 = vpop.eup %1518  ;;  %1530 = vrcp.f32 %v1083_v21  ;;  %1174 = vst.msk [vmem:[%s3011_s5 + $0x98] sm:$0xff] %vm432_vm2, %v1517_v12 }
 0x237   :  { %v1521_v37 = vpop.eup %1520  ;;  %1532 = vrcp.f32 %v1084_v46  ;;  %1175 = vst.msk [vmem:[%s3011_s5 + $0xa0] sm:$0xff] %vm432_vm2, %v1519_v3 }
 0x238   :  { %v1523_v51 = vpop.eup %1522  ;;  %1534 = vrcp.f32 %v1085_v4  ;;  %1176 = vst.msk [vmem:[%s3011_s5 + $0xa8] sm:$0xff] %vm432_vm2, %v1521_v37 }
 0x239   :  { %v1525_v55 = vpop.eup %1524  ;;  %1536 = vrcp.f32 %v1086_v57  ;;  %1177 = vst.msk [vmem:[%s3011_s5 + $0xb0] sm:$0xff] %vm432_vm2, %v1523_v51 }
 0x23a   :  { %v1527_v33 = vpop.eup %1526  ;;  %1538 = vrcp.f32 %v1087_v1  ;;  %1178 = vst.msk [vmem:[%s3011_s5 + $0xb8] sm:$0xff] %vm432_vm2, %v1525_v55 }
 0x23b   :  { %v1529_v43 = vpop.eup %1528  ;;  %1540 = vrcp.f32 %v1088_v50  ;;  %1179 = vst.msk [vmem:[%s3011_s5 + $0xc0] sm:$0xff] %vm432_vm2, %v1527_v33 }
 0x23c   :  { %v1531_v30 = vpop.eup %1530  ;;  %1542 = vrcp.f32 %v1089_v31  ;;  %1180 = vst.msk [vmem:[%s3011_s5 + $0xc8] sm:$0xff] %vm432_vm2, %v1529_v43 }
 0x23d   :  { %v1533_v45 = vpop.eup %1532  ;;  %1544 = vrcp.f32 %v1090_v36  ;;  %1181 = vst.msk [vmem:[%s3011_s5 + $0xd0] sm:$0xff] %vm432_vm2, %v1531_v30 }
 0x23e   :  { %v1535_v42 = vpop.eup %1534  ;;  %1546 = vrcp.f32 %v1091_v35  ;;  %1182 = vst.msk [vmem:[%s3011_s5 + $0xd8] sm:$0xff] %vm432_vm2, %v1533_v45 }
 0x23f   :  { %v1537_v59 = vpop.eup %1536  ;;  %1548 = vrcp.f32 %v1092_v60  ;;  %1183 = vst.msk [vmem:[%s3011_s5 + $0xe0] sm:$0xff] %vm432_vm2, %v1535_v42 }
 0x240   :  { %v1539_v63 = vpop.eup %1538  ;;  %1550 = vrcp.f32 %v1093_v2  ;;  %1184 = vst.msk [vmem:[%s3011_s5 + $0xe8] sm:$0xff] %vm432_vm2, %v1537_v59 }
 0x241   :  { %v1541_v22 = vpop.eup %1540  ;;  %1552 = vrcp.f32 %v1094_v61  ;;  %1185 = vst.msk [vmem:[%s3011_s5 + $0xf0] sm:$0xff] %vm432_vm2, %v1539_v63 }
 0x242   :  { %v1543_v26 = vpop.eup %1542  ;;  %1554 = vrcp.f32 %v1095_v62  ;;  %1186 = vst.msk [vmem:[%s3011_s5 + $0xf8] sm:$0xff] %vm432_vm2, %v1541_v22 }
 0x243   :  { %v1545_v40 = vpop.eup %1544  ;;  %1556 = vrcp.f32 %v1096_v27  ;;  %1187 = vst.msk [vmem:[%s3011_s5 + $0x100] sm:$0xff] %vm432_vm2, %v1543_v26 }
 0x244   :  { %v1547_v10 = vpop.eup %1546  ;;  %1558 = vrcp.f32 %v1097_v9  ;;  %1188 = vst.msk [vmem:[%s3011_s5 + $0x108] sm:$0xff] %vm432_vm2, %v1545_v40 }
 0x245   :  { %v1549_v28 = vpop.eup %1548  ;;  %1560 = vrcp.f32 %v1098_v34  ;;  %1189 = vst.msk [vmem:[%s3011_s5 + $0x110] sm:$0xff] %vm432_vm2, %v1547_v10 }
 0x246   :  { %v1551_v52 = vpop.eup %1550  ;;  %1562 = vrcp.f32 %v1099_v13  ;;  %1190 = vst.msk [vmem:[%s3011_s5 + $0x118] sm:$0xff] %vm432_vm2, %v1549_v28 }
 0x247   :  { %v1553_v0 = vpop.eup %1552  ;;  %1564 = vrcp.f32 %v1100_v6  ;;  %1191 = vst.msk [vmem:[%s3011_s5 + $0x120] sm:$0xff] %vm432_vm2, %v1551_v52 }
 0x248   :  { %v1555_v47 = vpop.eup %1554  ;;  %1566 = vrcp.f32 %v1101_v16  ;;  %1192 = vst.msk [vmem:[%s3011_s5 + $0x128] sm:$0xff] %vm432_vm2, %v1553_v0 }
 0x249   :  { %v1557_v20 = vpop.eup %1556  ;;  %1568 = vrcp.f32 %v1102_v48  ;;  %1193 = vst.msk [vmem:[%s3011_s5 + $0x130] sm:$0xff] %vm432_vm2, %v1555_v47 }
 0x24a   :  { %v1559_v39 = vpop.eup %1558  ;;  %1570 = vrcp.f32 %v1103_v19  ;;  %1194 = vst.msk [vmem:[%s3011_s5 + $0x138] sm:$0xff] %vm432_vm2, %v1557_v20 }
 0x24b   :  { %v1561_v5 = vpop.eup %1560  ;;  %1572 = vrcp.f32 %v1104_v53  ;;  %1195 = vst.msk [vmem:[%s3011_s5 + $0x140] sm:$0xff] %vm432_vm2, %v1559_v39 }
 0x24c   :  { %v1563_v11 = vpop.eup %1562  ;;  %1574 = vrcp.f32 %v1105_v24  ;;  %1196 = vst.msk [vmem:[%s3011_s5 + $0x148] sm:$0xff] %vm432_vm2, %v1561_v5 }
 0x24d   :  { %v1565_v29 = vpop.eup %1564  ;;  %1197 = vst.msk [vmem:[%s3011_s5 + $0x150] sm:$0xff] %vm432_vm2, %v1563_v11 }
 0x24e   :  { %v1567_v25 = vpop.eup %1566  ;;  %1198 = vst.msk [vmem:[%s3011_s5 + $0x158] sm:$0xff] %vm432_vm2, %v1565_v29 }
 0x24f   :  { %v1569_v44 = vpop.eup %1568  ;;  %1199 = vst.msk [vmem:[%s3011_s5 + $0x160] sm:$0xff] %vm432_vm2, %v1567_v25 }
 0x250   :  { %v1571_v17 = vpop.eup %1570  ;;  %1200 = vst.msk [vmem:[%s3011_s5 + $0x168] sm:$0xff] %vm432_vm2, %v1569_v44 }
 0x251   :  { %v1573_v41 = vpop.eup %1572  ;;  %1201 = vst.msk [vmem:[%s3011_s5 + $0x170] sm:$0xff] %vm432_vm2, %v1571_v17 }
 0x252   :  { %v1575_v7 = vpop.eup %1574  ;;  %1202 = vst.msk [vmem:[%s3011_s5 + $0x178] sm:$0xff] %vm432_vm2, %v1573_v41 }
 0x253   :  { %1203 = vst.msk [vmem:[%s3011_s5 + $0x180] sm:$0xff] %vm432_vm2, %v1575_v7 }

// kernel: lenet_forward.4
= control target key start
LH: loop header
LB: loop body
LE: loop exit
PB: predicated region body
PF: predicated region fallthrough
CT: control target
= control target key end

     0   :  { %vm186_vm0 = vcmask 1043456   ;;  %vm173_vm1 = vcmask 719872   ;;  %vm248_vm2 = vcmask 130048   ;;  %v544_v61 = vmov 50.0   ;;  %s711_s1 = inlined_call_operand.vmem [shape: bf16[216,16], index: 1, kind: input, shape index: {}]   ;;  %s712_s2 = inlined_call_operand.vmem [shape: f32[1,16], index: 2, kind: input, shape index: {}]   ;;  %s713_s0 = inlined_call_operand.vmem [shape: bf16[50,216], index: 0, kind: input, shape index: {}]   ;;  %s714_s3 = inlined_call_operand.vmem [shape: f32[1,16], index: 3, kind: input, shape index: {}]   ;;  %s715_s4 = inlined_call_operand.vmem [shape: f32[1,16], index: 4, kind: input, shape index: {}]   ;;  %s716_s5 = inlined_call_operand.vmem [shape: f32[50,16], index: 5, kind: output, shape index: {}]  }
   0x1   :  { %v488_v0 = vld [vmem:[%s711_s1 + $0x38] sm:$0xff]  ;;  %v54_v1 = vld [vmem:[%s711_s1 + $0x68] sm:$0xf]  ;;  %v487_v3 = vld [vmem:[%s711_s1 + $0x30] sm:$0xff]  ;;  %512 = vrcp.f32 %v544_v61  ;;  %vm260_vm3 = vcmask 123904  }
   0x2   :  { %v145_v2 = vunpack.c.l.b16 %v54_v1  ;;  %190 = vmatpush.bf16.msra.mxu0 %v488_v0  ;;  %494 = vmatpush.bf16.msra.mxu2 %v488_v0  ;;  %v493_v6 = vld [vmem:[%s711_s1 + $0x60] sm:$0xff]  ;;  %v486_v7 = vld [vmem:[%s711_s1 + $0x28] sm:$0xff]  ;;  %v492_v8 = vld [vmem:[%s711_s1 + $0x58] sm:$0xff] }
   0x3   :  { %v485_v9 = vld [vmem:[%s711_s1 + $0x20] sm:$0xff]  ;;  %v491_v10 = vld [vmem:[%s711_s1 + $0x50] sm:$0xff]  ;;  %v484_v11 = vld [vmem:[%s711_s1 + $0x18] sm:$0xff] }
   0x4   :  { %v159_v4 = vpack.c.b16 %v145_v2, %v145_v2  ;;  %v490_v12 = vld [vmem:[%s711_s1 + $0x48] sm:$0xff]  ;;  %v483_v13 = vld [vmem:[%s711_s1 + $0x10] sm:$0xff]  ;;  %v489_v14 = vld [vmem:[%s711_s1 + $0x40] sm:$0xff] }
   0x5   :  { %v482_v15 = vld [vmem:[%s711_s1 + $0x8] sm:$0xff]  ;;  %v477_v16 = vld [vmem:[%s713_s0 + $0x14] sm:$0xf]  ;;  %v407_v17 = vld [vmem:[%s713_s0 + $0x18] sm:$0xf0] }
   0x6   :  { %v188_v5 = vsel %vm186_vm0, %v159_v4, 0  ;;  %191 = vmatpush.bf16.msra.mxu0 %v487_v3  ;;  %495 = vmatpush.bf16.msra.mxu2 %v487_v3  ;;  %v475_v18 = vld [vmem:[%s713_s0 + $0x4] sm:$0xf]  ;;  %v399_v19 = vld [vmem:[%s713_s0 + $0x8] sm:$0xf0]  ;;  %v410_v20 = vor.u32 %v477_v16, %v407_v17 }
   0x7   :  { %502 = vmatpush.bf16.msra.mxu3 %v188_v5  ;;  %220 = vmatpush.bf16.msra.mxu1 %v188_v5  ;;  %v481_v21 = vld [vmem:[%s711_s1] sm:$0xff]  ;;  %v476_v23 = vld [vmem:[%s713_s0 + $0x4] sm:$0xf0]  ;;  %v402_v24 = vor.u32 %v475_v18, %v399_v19  ;;  %v415_v30 = vld [vmem:[%s713_s0 + $0x28] sm:$0xf0] }
   0x8   :  { %v397_v22 = vld [vmem:[%s713_s0] sm:$0xf]  ;;  %v480_v26 = vld [vmem:[%s713_s0 + $0x24] sm:$0xf0]  ;;  %v479_v29 = vld [vmem:[%s713_s0 + $0x24] sm:$0xf] }
   0x9   :  { %v413_v25 = vld [vmem:[%s713_s0 + $0x20] sm:$0xf]  ;;  %v398_v27 = vor.u32 %v476_v23, %v397_v22  ;;  %v27_v31 = vld [vmem:[%s713_s0 + $0x30] sm:$0x11]  ;;  %v418_v32 = vor.u32 %v479_v29, %v415_v30  ;;  %v478_v34 = vld [vmem:[%s713_s0 + $0x14] sm:$0xf0] }
   0xa   :  { %192 = vmatpush.bf16.msra.mxu0 %v486_v7  ;;  %496 = vmatpush.bf16.msra.mxu2 %v486_v7  ;;  %v414_v28 = vor.u32 %v480_v26, %v413_v25  ;;  %v405_v33 = vld [vmem:[%s713_s0 + $0x10] sm:$0xf]  ;;  %v78_v35 = vunpack.c.l.b16 %v27_v31  ;;  %v79_v38 = vunpack.c.h.b16 %v27_v31  ;;  %v509_v46 = vld [vmem:[%s712_s2] ss:$0 sm:$0xff] }
   0xb   :  { %503 = vmatpush.bf16.msra.mxu3 %v493_v6  ;;  %221 = vmatpush.bf16.msra.mxu1 %v493_v6  ;;  %v406_v36 = vor.u32 %v478_v34, %v405_v33 }
   0xc   :  { %v86_v37 = vpack.c.b16 %v78_v35, %v78_v35  ;;  %v87_v39 = vpack.c.b16 %v79_v38, %v79_v38 }
   0xe   :  { %193 = vmatpush.bf16.msra.mxu0 %v485_v9  ;;  %497 = vmatpush.bf16.msra.mxu2 %v485_v9 }
   0xf   :  { %504 = vmatpush.bf16.msra.mxu3 %v492_v8  ;;  %222 = vmatpush.bf16.msra.mxu1 %v492_v8  ;;  %v513_v8 = vpop.eup %512 }
  0x10   :  { %vm274_vm4 = vweird.f32 %v513_v8 }
  0x12   :  { %194 = vmatpush.bf16.msra.mxu0 %v484_v11  ;;  %498 = vmatpush.bf16.msra.mxu2 %v484_v11 }
  0x13   :  { %505 = vmatpush.bf16.msra.mxu3 %v491_v10  ;;  %223 = vmatpush.bf16.msra.mxu1 %v491_v10 }
  0x16   :  { %195 = vmatpush.bf16.msra.mxu0 %v483_v13  ;;  %499 = vmatpush.bf16.msra.mxu2 %v483_v13 }
  0x17   :  { %506 = vmatpush.bf16.msra.mxu3 %v490_v12  ;;  %224 = vmatpush.bf16.msra.mxu1 %v490_v12 }
  0x1a   :  { %196 = vmatpush.bf16.msra.mxu0 %v482_v15  ;;  %500 = vmatpush.bf16.msra.mxu2 %v482_v15  ;;  %v270_v15 = vmul.f32 50.0, %v513_v8 }
  0x1b   :  { %507 = vmatpush.bf16.msra.mxu3 %v489_v14  ;;  %225 = vmatpush.bf16.msra.mxu1 %v489_v14 }
  0x1e   :  { %472 = vmatmul.msk.bf16.vlgmr.msra.gmra.mxu3 %vm173_vm1, %v410_v20  ;;  %197 = vmatpush.bf16.msra.mxu0 %v481_v21 }
  0x1f   :  { %471 = vmatmul.msk.bf16.vlgmr.msra.gmra.mxu1 %vm173_vm1, %v402_v24  ;;  %501 = vmatpush.bf16.msra.mxu2 %v481_v21  ;;  %v271_v21 = vsub.f32 1.0, %v270_v15 }
  0x21   :  { %198 = vmatmul.bf16.vlgmr.msra.gmra.mxu0 %v398_v27  ;;  %v272_v24 = vmul.f32 %v513_v8, %v271_v21 }
  0x22   :  { %208 = vmatmul.bf16.vlgmr.msra.gmra.mxu2 %v414_v28 }
  0x23   :  { %v273_v28 = vadd.f32 %v513_v8, %v272_v24 }
  0x25   :  { %v275_v31 = vsel %vm274_vm4, %v513_v8, %v273_v28 }
  0x2e   :  { %473 = vmatmul.msk.bf16.gmra.mxu3 %vm173_vm1, %v418_v32 }
  0x31   :  { %203 = vmatmul.bf16.gmra.mxu0 %v406_v36 }
  0x32   :  { %213 = vmatmul.bf16.gmra.mxu2 %v86_v37 }
  0x3e   :  { %474 = vmatmul.msk.bf16.gmra.mxu3 %vm173_vm1, %v87_v39 }
  0x9c   :  { %v227_v42 = vpop.f32.mrf.mxu1 }
  0x9e   :  { %v199_v40 = vpop.f32.mrf.mxu0 }
  0x9f   :  { %v200_v51 = vadd.f32 %v509_v46, %v199_v40 }
  0xa1   :  { %v232_v41 = vpop.f32.mrf.mxu3  ;;  %v228_v55 = vadd.f32 %v227_v42, %v200_v51 }
  0xa3   :  { %v249_v62 = vsel %vm248_vm2, %v228_v55, 0.0 }
  0xa4   :  { %v229_v49 = vpop.f32.mrf.mxu1 }
  0xa5   :  { %v209_v43 = vpop.f32.mrf.mxu2 }
  0xa6   :  { %v201_v44 = vpop.f32.mrf.mxu0  ;;  %v210_v57 = vadd.f32 %v509_v46, %v209_v43 }
  0xa7   :  { %v202_v47 = vadd.f32 %v509_v46, %v201_v44 }
  0xa9   :  { %v234_v45 = vpop.f32.mrf.mxu3  ;;  %v230_v54 = vadd.f32 %v229_v49, %v202_v47 }
  0xab   :  { %v250_v58 = vsel %vm248_vm2, %v230_v54, 0.0 }
  0xac   :  { %v251_v1 = vadd.f32 %v250_v58, %v249_v62 }
  0xad   :  { %v211_v48 = vpop.f32.mrf.mxu2 }
  0xae   :  { %v204_v50 = vpop.f32.mrf.mxu0  ;;  %v212_v6 = vadd.f32 %v509_v46, %v211_v48 }
  0xaf   :  { %v205_v52 = vadd.f32 %v509_v46, %v204_v50 }
  0xb1   :  { %v237_v53 = vpop.f32.mrf.mxu3  ;;  %v233_v56 = vadd.f32 %v232_v41, %v205_v52 }
  0xb2   :  { %v238_v3 = vadd.f32 %v237_v53, %v210_v57 }
  0xb3   :  { %v252_v63 = vsel %vm248_vm2, %v233_v56, 0.0 }
  0xb4   :  { %v253_v5 = vadd.f32 %v252_v63, %v251_v1  ;;  %v256_v10 = vsel %vm248_vm2, %v238_v3, 0.0 }
  0xb5   :  { %v214_v59 = vpop.f32.mrf.mxu2 }
  0xb6   :  { %v206_v60 = vpop.f32.mrf.mxu0  ;;  %v215_v11 = vadd.f32 %v509_v46, %v214_v59 }
  0xb7   :  { %v207_v0 = vadd.f32 %v509_v46, %v206_v60 }
  0xb9   :  { %v239_v2 = vpop.f32.mrf.mxu3  ;;  %v235_v4 = vadd.f32 %v234_v45, %v207_v0 }
  0xba   :  { %v240_v12 = vadd.f32 %v239_v2, %v212_v6 }
  0xbb   :  { %v254_v7 = vsel %vm248_vm2, %v235_v4, 0.0 }
  0xbc   :  { %v255_v9 = vadd.f32 %v254_v7, %v253_v5  ;;  %v258_v17 = vsel %vm248_vm2, %v240_v12, 0.0 }
  0xbd   :  { %v216_v13 = vpop.f32.mrf.mxu2 }
  0xbe   :  { %v257_v14 = vadd.f32 %v256_v10, %v255_v9 }
  0xc0   :  { %v259_v19 = vadd.f32 %v258_v17, %v257_v14  ;;  %v511_v17 = vld [vmem:[%s715_s4] ss:$0 sm:$0xff] }
  0xc1   :  { %v242_v16 = vpop.f32.mrf.mxu3 }
  0xc2   :  { %v243_v18 = vadd.f32 %v242_v16, %v215_v11  ;;  %v510_v11 = vld [vmem:[%s714_s3] ss:$0 sm:$0xff] }
  0xc4   :  { %v261_v20 = vsel %vm260_vm3, %v243_v18, 0.0 }
  0xc5   :  { %v262_v22 = vadd.f32 %v261_v20, %v259_v19 }
  0xc7   :  { %v263_v23 = vrot.slane %v262_v22, 4 }
  0xc9   :  { %v264_v25 = vadd.f32 %v263_v23, %v262_v22  ;;  %v244_v26 = vpop.f32.mrf.mxu3 }
  0xcb   :  { %v265_v27 = vrot.slane %v264_v25, 2 }
  0xcd   :  { %v266_v29 = vadd.f32 %v265_v27, %v264_v25 }
  0xcf   :  { %v267_v30 = vrot.slane %v266_v29, 1 }
  0xd1   :  { %v268_v32 = vadd.f32 %v267_v30, %v266_v29 }
  0xd3   :  { %v276_v33 = vmul.f32 %v275_v31, %v268_v32 }
  0xd5   :  { %v277_v34 = vsub.f32 %v228_v55, %v276_v33  ;;  %v278_v35 = vsub.f32 %v230_v54, %v276_v33  ;;  %v279_v36 = vsub.f32 %v233_v56, %v276_v33  ;;  %v280_v37 = vsub.f32 %v235_v4, %v276_v33 }
  0xd6   :  { %v281_v38 = vsub.f32 %v238_v3, %v276_v33  ;;  %v282_v42 = vsub.f32 %v240_v12, %v276_v33  ;;  %v283_v47 = vsub.f32 %v243_v18, %v276_v33 }
  0xd7   :  { %v284_v39 = vmul.f32 %v277_v34, %v277_v34  ;;  %v285_v40 = vmul.f32 %v278_v35, %v278_v35  ;;  %v286_v41 = vmul.f32 %v279_v36, %v279_v36  ;;  %v287_v43 = vmul.f32 %v280_v37, %v280_v37 }
  0xd8   :  { %v288_v48 = vmul.f32 %v281_v38, %v281_v38  ;;  %v289_v51 = vmul.f32 %v282_v42, %v282_v42  ;;  %v290_v54 = vmul.f32 %v283_v47, %v283_v47 }
  0xd9   :  { %v291_v44 = vsel %vm248_vm2, %v284_v39, 0.0  ;;  %v292_v45 = vsel %vm248_vm2, %v285_v40, 0.0  ;;  %v294_v49 = vsel %vm248_vm2, %v286_v41, 0.0  ;;  %v296_v52 = vsel %vm248_vm2, %v287_v43, 0.0 }
  0xda   :  { %v293_v46 = vadd.f32 %v292_v45, %v291_v44  ;;  %v298_v55 = vsel %vm248_vm2, %v288_v48, 0.0  ;;  %v300_v57 = vsel %vm248_vm2, %v289_v51, 0.0  ;;  %v302_v59 = vsel %vm260_vm3, %v290_v54, 0.0 }
  0xdc   :  { %v295_v50 = vadd.f32 %v294_v49, %v293_v46 }
  0xde   :  { %v297_v53 = vadd.f32 %v296_v52, %v295_v50 }
  0xe0   :  { %v299_v56 = vadd.f32 %v298_v55, %v297_v53 }
  0xe2   :  { %v301_v58 = vadd.f32 %v300_v57, %v299_v56 }
  0xe4   :  { %v303_v60 = vadd.f32 %v302_v59, %v301_v58 }
  0xe6   :  { %v304_v61 = vrot.slane %v303_v60, 4 }
  0xe8   :  { %v305_v62 = vadd.f32 %v304_v61, %v303_v60 }
  0xea   :  { %v306_v63 = vrot.slane %v305_v62, 2 }
  0xec   :  { %v307_v0 = vadd.f32 %v306_v63, %v305_v62 }
  0xee   :  { %v308_v1 = vrot.slane %v307_v0, 1 }
  0xf0   :  { %v309_v2 = vadd.f32 %v308_v1, %v307_v0 }
  0xf2   :  { %v310_v3 = vmul.f32 %v309_v2, %v275_v31 }
  0xf4   :  { %v311_v4 = vadd.f32 1e-05, %v310_v3 }
  0xf6   :  { %514 = vrsqrt.f32 %v311_v4  ;;  %vm318_vm6 = vweird.f32 %v311_v4 }
  0xfc   :  { %v515_v5 = vpop.eup %514 }
  0xfd   :  { %v313_v6 = vmul.f32 %v515_v5, %v311_v4  ;;  %vm319_vm5 = vweird.f32 %v515_v5 }
  0xfe   :  { %vm320_vm7 = vmor %vm318_vm6, %vm319_vm5 }
  0xff   :  { %v314_v7 = vmul.f32 %v515_v5, %v313_v6 }
 0x101   :  { %v315_v8 = vmul.f32 0.5, %v314_v7 }
 0x103   :  { %v316_v9 = vsub.f32 1.5, %v315_v8 }
 0x105   :  { %v317_v10 = vmul.f32 %v515_v5, %v316_v9 }
 0x107   :  { %v321_v12 = vsel %vm320_vm7, %v515_v5, %v317_v10 }
 0x108   :  { %v322_v13 = vmul.f32 %v321_v12, %v277_v34  ;;  %v323_v14 = vmul.f32 %v321_v12, %v278_v35  ;;  %v324_v15 = vmul.f32 %v321_v12, %v279_v36  ;;  %v325_v16 = vmul.f32 %v321_v12, %v280_v37 }
 0x109   :  { %v326_v18 = vmul.f32 %v321_v12, %v281_v38  ;;  %v327_v19 = vmul.f32 %v321_v12, %v282_v42  ;;  %v328_v20 = vmul.f32 %v321_v12, %v283_v47 }
 0x10a   :  { %v332_v21 = vmul.f32 %v510_v11, %v322_v13  ;;  %v333_v22 = vmul.f32 %v510_v11, %v323_v14  ;;  %v334_v23 = vmul.f32 %v510_v11, %v324_v15  ;;  %v335_v24 = vmul.f32 %v510_v11, %v325_v16 }
 0x10b   :  { %v336_v25 = vmul.f32 %v510_v11, %v326_v18  ;;  %v337_v26 = vmul.f32 %v510_v11, %v327_v19  ;;  %v338_v27 = vmul.f32 %v510_v11, %v328_v20 }
 0x10c   :  { %v342_v28 = vadd.f32 %v511_v17, %v332_v21  ;;  %v343_v29 = vadd.f32 %v511_v17, %v333_v22  ;;  %v344_v30 = vadd.f32 %v511_v17, %v334_v23  ;;  %v345_v31 = vadd.f32 %v511_v17, %v335_v24 }
 0x10d   :  { %v346_v32 = vadd.f32 %v511_v17, %v336_v25  ;;  %v347_v33 = vadd.f32 %v511_v17, %v337_v26  ;;  %v348_v34 = vadd.f32 %v511_v17, %v338_v27 }
 0x10e   :  { %v349_v35 = vsub.f32 0.0, %v342_v28  ;;  %v350_v36 = vsub.f32 0.0, %v343_v29  ;;  %v351_v37 = vsub.f32 0.0, %v344_v30  ;;  %v352_v38 = vsub.f32 0.0, %v345_v31 }
 0x10f   :  { %v353_v39 = vsub.f32 0.0, %v346_v32  ;;  %v354_v40 = vsub.f32 0.0, %v347_v33  ;;  %v355_v41 = vsub.f32 0.0, %v348_v34 }
 0x110   :  { %v356_v42 = vmul.f32 1.442695, %v349_v35  ;;  %v358_v43 = vmul.f32 1.442695, %v350_v36  ;;  %v360_v44 = vmul.f32 1.442695, %v351_v37 }
 0x111   :  { %v362_v45 = vmul.f32 1.442695, %v352_v38  ;;  %v364_v46 = vmul.f32 1.442695, %v353_v39  ;;  %v366_v47 = vmul.f32 1.442695, %v354_v40 }
 0x112   :  { %516 = vpow2.f32 %v356_v42  ;;  %v368_v48 = vmul.f32 1.442695, %v355_v41 }
 0x113   :  { %518 = vpow2.f32 %v358_v43 }
 0x114   :  { %520 = vpow2.f32 %v360_v44 }
 0x115   :  { %522 = vpow2.f32 %v362_v45 }
 0x116   :  { %524 = vpow2.f32 %v364_v46 }
 0x117   :  { %526 = vpow2.f32 %v366_v47 }
 0x118   :  { %v517_v49 = vpop.eup %516  ;;  %528 = vpow2.f32 %v368_v48 }
 0x119   :  { %v519_v50 = vpop.eup %518  ;;  %v370_v51 = vadd.f32 1.0, %v517_v49 }
 0x11a   :  { %v521_v52 = vpop.eup %520  ;;  %v371_v53 = vadd.f32 1.0, %v519_v50 }
 0x11b   :  { %v523_v54 = vpop.eup %522  ;;  %v372_v55 = vadd.f32 1.0, %v521_v52  ;;  %530 = vrcp.f32 %v370_v51 }
 0x11c   :  { %v525_v56 = vpop.eup %524  ;;  %v373_v57 = vadd.f32 1.0, %v523_v54  ;;  %532 = vrcp.f32 %v371_v53 }
 0x11d   :  { %v527_v58 = vpop.eup %526  ;;  %v374_v59 = vadd.f32 1.0, %v525_v56  ;;  %534 = vrcp.f32 %v372_v55 }
 0x11e   :  { %v529_v60 = vpop.eup %528  ;;  %v375_v61 = vadd.f32 1.0, %v527_v58  ;;  %536 = vrcp.f32 %v373_v57 }
 0x11f   :  { %v376_v62 = vadd.f32 1.0, %v529_v60  ;;  %538 = vrcp.f32 %v374_v59 }
 0x120   :  { %540 = vrcp.f32 %v375_v61 }
 0x121   :  { %v531_v63 = vpop.eup %530  ;;  %542 = vrcp.f32 %v376_v62 }
 0x122   :  { %v533_v0 = vpop.eup %532  ;;  %384 = vst.msk [vmem:[%s716_s5] sm:$0xff] %vm248_vm2, %v531_v63 }
 0x123   :  { %v535_v1 = vpop.eup %534  ;;  %385 = vst.msk [vmem:[%s716_s5 + $0x8] sm:$0xff] %vm248_vm2, %v533_v0 }
 0x124   :  { %v537_v2 = vpop.eup %536  ;;  %386 = vst.msk [vmem:[%s716_s5 + $0x10] sm:$0xff] %vm248_vm2, %v535_v1 }
 0x125   :  { %v539_v3 = vpop.eup %538  ;;  %387 = vst.msk [vmem:[%s716_s5 + $0x18] sm:$0xff] %vm248_vm2, %v537_v2 }
 0x126   :  { %v541_v4 = vpop.eup %540  ;;  %388 = vst.msk [vmem:[%s716_s5 + $0x20] sm:$0xff] %vm248_vm2, %v539_v3 }
 0x127   :  { %v543_v5 = vpop.eup %542  ;;  %389 = vst.msk [vmem:[%s716_s5 + $0x28] sm:$0xff] %vm248_vm2, %v541_v4 }
 0x128   :  { %390 = vst.msk [vmem:[%s716_s5 + $0x30] sm:$0x3] %vm260_vm3, %v543_v5 }

// kernel: lenet_forward.5
= control target key start
LH: loop header
LB: loop body
LE: loop exit
PB: predicated region body
PF: predicated region fallthrough
CT: control target
= control target key end

     0   :  { %s1064_s0 = inlined_call_operand.vmem [shape: bf16[2,400], index: 0, kind: input, shape index: {}]   ;;  %s1065_s1 = inlined_call_operand.vmem [shape: bf16[400,120], index: 1, kind: input, shape index: {}]   ;;  %s1066_s2 = inlined_call_operand.vmem [shape: f32[1,120], index: 2, kind: input, shape index: {}]   ;;  %s1067_s3 = inlined_call_operand.vmem [shape: f32[1,120], index: 3, kind: input, shape index: {}]   ;;  %s1068_s4 = inlined_call_operand.vmem [shape: f32[1,120], index: 4, kind: input, shape index: {}]   ;;  %s1069_s5 = inlined_call_operand.vmem [shape: bf16[120,84], index: 5, kind: input, shape index: {}]   ;;  %s1070_s6 = inlined_call_operand.vmem [shape: f32[1,84], index: 6, kind: input, shape index: {}]   ;;  %s1071_s7 = inlined_call_operand.vmem [shape: f32[1,84], index: 7, kind: input, shape index: {}]   ;;  %s1072_s8 = inlined_call_operand.vmem [shape: f32[1,84], index: 8, kind: input, shape index: {}]   ;;  %s1073_s9 = inlined_call_operand.vmem [shape: bf16[84,10], index: 9, kind: input, shape index: {}]   ;;  %s1074_s10 = inlined_call_operand.vmem [shape: f32[1,10], index: 10, kind: input, shape index: {}]   ;;  %s1075_s11 = inlined_call_operand.hbm [shape: f32[2,10], index: 11, kind: output, shape index: {}]  }
   0x1   :  { %v764_v0 = vld [vmem:[%s1065_s1 + $0x38] sm:$0xff]  ;;  %v763_v3 = vld [vmem:[%s1065_s1 + $0x30] sm:$0xff]  ;;  %v762_v6 = vld [vmem:[%s1065_s1 + $0x28] sm:$0xff] }
   0x2   :  { %v772_v1 = vld [vmem:[%s1065_s1 + $0x78] sm:$0xff]  ;;  %257 = vmatpush.bf16.msra.mxu0 %v764_v0  ;;  %v771_v4 = vld [vmem:[%s1065_s1 + $0x70] sm:$0xff]  ;;  %v770_v7 = vld [vmem:[%s1065_s1 + $0x68] sm:$0xff] }
   0x3   :  { %v780_v2 = vld [vmem:[%s1065_s1 + $0xb8] sm:$0xff]  ;;  %270 = vmatpush.bf16.msra.mxu1 %v772_v1  ;;  %v779_v5 = vld [vmem:[%s1065_s1 + $0xb0] sm:$0xff]  ;;  %v781_v8 = vld [vmem:[%s1065_s1 + $0xc0] sm:$0xff] }
   0x4   :  { %283 = vmatpush.bf16.msra.mxu2 %v780_v2  ;;  %v778_v9 = vld [vmem:[%s1065_s1 + $0xa8] sm:$0xff]  ;;  %v40_v10 = vld [vmem:[%s1064_s0] sm:$0xf]  ;;  %303 = vmatpush.bf16.msra.mxu3 %v781_v8 }
   0x5   :  { %v761_v11 = vld [vmem:[%s1065_s1 + $0x20] sm:$0xff]  ;;  %96 = vst [vmem:[#allocation1] ss:$9 sm:$0xff] %v40_v10 }
   0x6   :  { %258 = vmatpush.bf16.msra.mxu0 %v763_v3  ;;  %v769_v12 = vld [vmem:[%s1065_s1 + $0x60] sm:$0xff] }
   0x7   :  { %271 = vmatpush.bf16.msra.mxu1 %v771_v4  ;;  %v777_v13 = vld [vmem:[%s1065_s1 + $0xa0] sm:$0xff] }
   0x8   :  { %284 = vmatpush.bf16.msra.mxu2 %v779_v5 }
   0xa   :  { %259 = vmatpush.bf16.msra.mxu0 %v762_v6 }
   0xb   :  { %272 = vmatpush.bf16.msra.mxu1 %v770_v7 }
   0xc   :  { %285 = vmatpush.bf16.msra.mxu2 %v778_v9 }
   0xd   :  { %16 = vsyncpa [#allocation3], 0  ;;  %vm254_vm0 = vcmask 130048   ;;  %v760_v14 = vld [vmem:[%s1065_s1 + $0x18] sm:$0xff]  ;;  %v759_v18 = vld [vmem:[%s1065_s1 + $0x10] sm:$0xff]  ;;  %v847_v32 = vmov 2.0  }
   0xe   :  { %260 = vmatpush.bf16.msra.mxu0 %v761_v11  ;;  %v768_v15 = vld [vmem:[%s1065_s1 + $0x58] sm:$0xff]  ;;  %v767_v19 = vld [vmem:[%s1065_s1 + $0x50] sm:$0xff]  ;;  %v758_v21 = vld [vmem:[%s1065_s1 + $0x8] sm:$0xff]  ;;  %803 = vrcp.f32 %v847_v32  ;;  %vm311_vm1 = vcmask 975872   ;;  %vm431_vm3 = vcmask 1043456   ;;  %vm427_vm7 = vcmask 982016  }
   0xf   :  { %273 = vmatpush.bf16.msra.mxu1 %v769_v12  ;;  %v776_v16 = vld [vmem:[%s1065_s1 + $0x98] sm:$0xff]  ;;  %v775_v20 = vld [vmem:[%s1065_s1 + $0x90] sm:$0xff]  ;;  %v766_v22 = vld [vmem:[%s1065_s1 + $0x48] sm:$0xff]  ;;  %vm450_vm8 = vcmask 680960   ;;  %vm547_vm9 = vcmask 1041408   ;;  %vm543_vm13 = vcmask 687104  }
  0x10   :  { %286 = vmatpush.bf16.msra.mxu2 %v777_v13  ;;  %v100_v17 = vld [vmem:[#allocation1 + $0x1b] sm:$0xff]  ;;  %v774_v23 = vld [vmem:[%s1065_s1 + $0x88] sm:$0xff]  ;;  %v99_v29 = vld [vmem:[#allocation1 + $0x12] sm:$0xff]  ;;  %vm564_vm14 = vcmask 74752   ;;  %s597_s24 = sshll.u32 %s1075_s11, 4  ;;  %s598_s24 = int_to_ptr.hbm [resolvable:$true] %s597_s24 }
  0x11   :  { %706 = vmatmul.msk.bf16.vlgmr.msra.gmra.mxu3 %vm254_vm0, %v100_v17  ;;  %v757_v24 = vld [vmem:[%s1065_s1] sm:$0xff]  ;;  %v98_v28 = vld [vmem:[#allocation1 + $0x9] sm:$0xff]  ;;  %v377_v58 = vld [vmem:[%s1069_s5 + $0x38] sm:$0xf] }
  0x12   :  { %261 = vmatpush.bf16.msra.mxu0 %v760_v14  ;;  %v765_v25 = vld [vmem:[%s1065_s1 + $0x40] sm:$0xff]  ;;  %v411_v59 = vunpack.c.l.b16 %v377_v58  ;;  %v788_v2 = vld [vmem:[%s1069_s5 + $0x30] sm:$0xff]  ;;  %v787_v5 = vld [vmem:[%s1069_s5 + $0x28] sm:$0xff] }
  0x13   :  { %274 = vmatpush.bf16.msra.mxu1 %v768_v15  ;;  %v773_v26 = vld [vmem:[%s1065_s1 + $0x80] sm:$0xff]  ;;  %v785_v10 = vld [vmem:[%s1069_s5 + $0x18] sm:$0xff]  ;;  %v784_v13 = vld [vmem:[%s1069_s5 + $0x10] sm:$0xff] }
  0x14   :  { %287 = vmatpush.bf16.msra.mxu2 %v776_v16  ;;  %v97_v27 = vld [vmem:[#allocation1] sm:$0xff]  ;;  %v804_v37 = vpop.eup %803  ;;  %v419_v61 = vpack.c.b16 %v411_v59, %v411_v59  ;;  %v783_v14 = vld [vmem:[%s1069_s5 + $0x8] sm:$0xff] }
  0x15   :  { %v796_v31 = vld [vmem:[%s1066_s2] ss:$0 sm:$0xff]  ;;  %v320_v39 = vmul.f32 2.0, %v804_v37  ;;  %vm324_vm2 = vweird.f32 %v804_v37 }
  0x16   :  { %262 = vmatpush.bf16.msra.mxu0 %v759_v18  ;;  %v433_v63 = vsel %vm431_vm3, %v419_v61, 0  ;;  %v786_v8 = vld [vmem:[%s1069_s5 + $0x20] sm:$0xff] }
  0x17   :  { %275 = vmatpush.bf16.msra.mxu1 %v767_v19  ;;  %v321_v45 = vsub.f32 1.0, %v320_v39  ;;  %435 = vmatpush.bf16.msrb.mxu3 %v433_v63  ;;  %v782_v17 = vld [vmem:[%s1069_s5] sm:$0xff] }
  0x18   :  { %288 = vmatpush.bf16.msra.mxu2 %v775_v20  ;;  %v793_v59 = vld [vmem:[%s1073_s9 + $0x20] sm:$0xff] }
  0x19   :  { %v322_v48 = vmul.f32 %v804_v37, %v321_v45 }
  0x1a   :  { %263 = vmatpush.bf16.msra.mxu0 %v758_v21 }
  0x1b   :  { %276 = vmatpush.bf16.msra.mxu1 %v766_v22  ;;  %v323_v52 = vadd.f32 %v804_v37, %v322_v48  ;;  %436 = vmatpush.bf16.msrb.mxu3 %v788_v2  ;;  %v797_v22 = vld [vmem:[%s1067_s3] ss:$0 sm:$0xff] }
  0x1c   :  { %289 = vmatpush.bf16.msra.mxu2 %v774_v23 }
  0x1d   :  { %v991_v55 = vsel %vm324_vm2, %v804_v37, %v323_v52 }
  0x1e   :  { %264 = vmatpush.bf16.msra.mxu0 %v757_v24 }
  0x1f   :  { %277 = vmatpush.bf16.msra.mxu1 %v765_v25  ;;  %437 = vmatpush.bf16.msrb.mxu3 %v787_v5  ;;  %v798_v25 = vld [vmem:[%s1068_s4] ss:$0 sm:$0xff] }
  0x20   :  { %290 = vmatpush.bf16.msra.mxu2 %v773_v26 }
  0x21   :  { %265 = vmatmul.bf16.vlgmr.msra.gmra.mxu0 %v97_v27 }
  0x22   :  { %278 = vmatmul.bf16.vlgmr.msra.gmra.mxu1 %v98_v28 }
  0x23   :  { %291 = vmatmul.bf16.vlgmr.msra.gmra.mxu2 %v99_v29  ;;  %438 = vmatpush.bf16.msrb.mxu3 %v786_v8  ;;  %v800_v8 = vld [vmem:[%s1071_s7] ss:$0 sm:$0xff] }
  0x27   :  { %439 = vmatpush.bf16.msrb.mxu3 %v785_v10 }
  0x2b   :  { %440 = vmatpush.bf16.msrb.mxu3 %v784_v13 }
  0x2f   :  { %441 = vmatpush.bf16.msrb.mxu3 %v783_v14 }
  0x33   :  { %442 = vmatpush.bf16.msrb.mxu3 %v782_v17 }
  0x94   :  { %v305_v30 = vpop.f32.mrf.mxu3 }
  0x9c   :  { %v307_v33 = vpop.f32.mrf.mxu3 }
  0x9e   :  { %v266_v34 = vpop.f32.mrf.mxu0 }
  0x9f   :  { %v279_v35 = vpop.f32.mrf.mxu1  ;;  %v267_v36 = vadd.f32 %v796_v31, %v266_v34  ;;  %v799_v34 = vld [vmem:[%s1070_s6] ss:$0 sm:$0xff] }
  0xa1   :  { %v280_v38 = vadd.f32 %v279_v35, %v267_v36 }
  0xa6   :  { %v292_v40 = vpop.f32.mrf.mxu2  ;;  %v268_v42 = vpop.f32.mrf.mxu0 }
  0xa7   :  { %v293_v41 = vadd.f32 %v292_v40, %v280_v38  ;;  %v281_v43 = vpop.f32.mrf.mxu1 }
  0xa9   :  { %v306_v44 = vadd.f32 %v305_v30, %v293_v41 }
  0xab   :  { %v312_v46 = vsel %vm311_vm1, %v306_v44, 0.0 }
  0xac   :  { %v313_v47 = vrot.slane %v312_v46, 4 }
  0xae   :  { %v314_v49 = vadd.f32 %v313_v47, %v312_v46  ;;  %v294_v50 = vpop.f32.mrf.mxu2 }
  0xaf   :  { %v505_v50 = vld [vmem:[%s1073_s9 + $0x28] sm:$0x3] }
  0xb0   :  { %v315_v51 = vrot.slane %v314_v49, 2  ;;  %v531_v52 = vunpack.c.l.b16 %v505_v50 }
  0xb2   :  { %v316_v53 = vadd.f32 %v315_v51, %v314_v49 }
  0xb4   :  { %v317_v54 = vrot.slane %v316_v53, 1 }
  0xb6   :  { %v318_v56 = vadd.f32 %v317_v54, %v316_v53  ;;  %v537_v54 = vpack.c.b16 %v531_v52, %v531_v52 }
  0xb8   :  { %v326_v57 = vmul.f32 %v991_v55, %v318_v56 }
  0xba   :  { %v327_v60 = vsub.f32 %v306_v44, %v326_v57  ;;  %v549_v57 = vsel %vm547_vm9, %v537_v54, 0 }
  0xbb   :  { %553 = vmatpush.bf16.msrb.mxu0 %v549_v57 }
  0xbc   :  { %v328_v62 = vmul.f32 %v327_v60, %v327_v60 }
  0xbe   :  { %v329_v0 = vsel %vm311_vm1, %v328_v62, 0.0  ;;  %v792_v62 = vld [vmem:[%s1073_s9 + $0x18] sm:$0xff] }
  0xbf   :  { %v330_v1 = vrot.slane %v329_v0, 4  ;;  %554 = vmatpush.bf16.msrb.mxu0 %v793_v59 }
  0xc1   :  { %v331_v3 = vadd.f32 %v330_v1, %v329_v0  ;;  %v791_v0 = vld [vmem:[%s1073_s9 + $0x10] sm:$0xff]  ;;  %v790_v1 = vld [vmem:[%s1073_s9 + $0x8] sm:$0xff] }
  0xc3   :  { %v332_v4 = vrot.slane %v331_v3, 2  ;;  %555 = vmatpush.bf16.msrb.mxu0 %v792_v62 }
  0xc5   :  { %v333_v6 = vadd.f32 %v332_v4, %v331_v3 }
  0xc7   :  { %v334_v7 = vrot.slane %v333_v6, 1  ;;  %556 = vmatpush.bf16.msrb.mxu0 %v791_v0 }
  0xc9   :  { %v335_v9 = vadd.f32 %v334_v7, %v333_v6 }
  0xcb   :  { %v336_v11 = vmul.f32 %v335_v9, %v991_v55  ;;  %557 = vmatpush.bf16.msrb.mxu0 %v790_v1 }
  0xcd   :  { %v337_v12 = vadd.f32 1e-05, %v336_v11  ;;  %v801_v11 = vld [vmem:[%s1072_s8] ss:$0 sm:$0xff]  ;;  %s848_s8 = smov [#allocation2]  }
  0xcf   :  { %805 = vrsqrt.f32 %v337_v12  ;;  %vm344_vm5 = vweird.f32 %v337_v12 }
  0xd5   :  { %v806_v15 = vpop.eup %805 }
  0xd6   :  { %v339_v16 = vmul.f32 %v806_v15, %v337_v12  ;;  %vm345_vm4 = vweird.f32 %v806_v15 }
  0xd7   :  { %vm346_vm6 = vmor %vm344_vm5, %vm345_vm4 }
  0xd8   :  { %v340_v18 = vmul.f32 %v806_v15, %v339_v16 }
  0xda   :  { %v341_v19 = vmul.f32 0.5, %v340_v18 }
  0xdc   :  { %v342_v20 = vsub.f32 1.5, %v341_v19 }
  0xde   :  { %v343_v21 = vmul.f32 %v806_v15, %v342_v20  ;;  %v802_v20 = vld [vmem:[%s1074_s10] ss:$0 sm:$0xff]  ;;  %s595_s10 = sshll.u32 %s848_s8, 4  ;;  %s596_s10 = int_to_ptr.vmem [resolvable:$true] %s595_s10 }
  0xe0   :  { %v347_v23 = vsel %vm346_vm6, %v806_v15, %v343_v21 }
  0xe1   :  { %v348_v24 = vmul.f32 %v347_v23, %v327_v60 }
  0xe3   :  { %v352_v26 = vmul.f32 %v797_v22, %v348_v24 }
  0xe5   :  { %v356_v27 = vadd.f32 %v798_v25, %v352_v26 }
  0xe7   :  { %v357_v28 = vsub.f32 0.0, %v356_v27 }
  0xe9   :  { %v358_v29 = vmul.f32 1.442695, %v357_v28 }
  0xeb   :  { %807 = vpow2.f32 %v358_v29 }
  0xf1   :  { %v808_v30 = vpop.eup %807 }
  0xf2   :  { %v360_v31 = vadd.f32 1.0, %v808_v30 }
  0xf4   :  { %809 = vrcp.f32 %v360_v31 }
  0xfa   :  { %v810_v32 = vpop.eup %809 }
  0xfb   :  { %v362_v33 = vpack.c.bf16 %v810_v32, %v810_v32 }
  0xfd   :  { %735 = vmatmul.msk.bf16.vlgmr.msrb.gmra.mxu3 %vm427_vm7, %v362_v33 }
 0x180   :  { %v444_v35 = vpop.f32.mrf.mxu3 }
 0x181   :  { %v445_v36 = vadd.f32 %v799_v34, %v444_v35 }
 0x183   :  { %v451_v37 = vsel %vm450_vm8, %v445_v36, 0.0 }
 0x184   :  { %v452_v38 = vrot.slane %v451_v37, 4 }
 0x186   :  { %v453_v39 = vadd.f32 %v452_v38, %v451_v37 }
 0x188   :  { %v454_v40 = vrot.slane %v453_v39, 2  ;;  %v446_v41 = vpop.f32.mrf.mxu3 }
 0x18a   :  { %v455_v42 = vadd.f32 %v454_v40, %v453_v39 }
 0x18c   :  { %v456_v43 = vrot.slane %v455_v42, 1 }
 0x18e   :  { %v457_v44 = vadd.f32 %v456_v43, %v455_v42 }
 0x190   :  { %v458_v45 = vmul.f32 %v457_v44, %v991_v55 }
 0x192   :  { %v459_v46 = vsub.f32 %v445_v36, %v458_v45 }
 0x194   :  { %v460_v47 = vmul.f32 %v459_v46, %v459_v46 }
 0x196   :  { %v461_v48 = vsel %vm450_vm8, %v460_v47, 0.0 }
 0x197   :  { %v462_v49 = vrot.slane %v461_v48, 4 }
 0x199   :  { %v463_v51 = vadd.f32 %v462_v49, %v461_v48 }
 0x19b   :  { %v464_v53 = vrot.slane %v463_v51, 2 }
 0x19d   :  { %v465_v56 = vadd.f32 %v464_v53, %v463_v51 }
 0x19f   :  { %v466_v58 = vrot.slane %v465_v56, 1 }
 0x1a1   :  { %v467_v60 = vadd.f32 %v466_v58, %v465_v56 }
 0x1a3   :  { %v468_v61 = vmul.f32 %v467_v60, %v991_v55  ;;  %v789_v55 = vld [vmem:[%s1073_s9] sm:$0xff] }
 0x1a4   :  { %558 = vmatpush.bf16.msrb.mxu0 %v789_v55 }
 0x1a5   :  { %v469_v63 = vadd.f32 1e-05, %v468_v61 }
 0x1a7   :  { %811 = vrsqrt.f32 %v469_v63  ;;  %vm476_vm11 = vweird.f32 %v469_v63 }
 0x1ad   :  { %v812_v2 = vpop.eup %811 }
 0x1ae   :  { %v471_v3 = vmul.f32 %v812_v2, %v469_v63  ;;  %vm477_vm10 = vweird.f32 %v812_v2 }
 0x1af   :  { %vm478_vm12 = vmor %vm476_vm11, %vm477_vm10 }
 0x1b0   :  { %v472_v4 = vmul.f32 %v812_v2, %v471_v3 }
 0x1b2   :  { %v473_v5 = vmul.f32 0.5, %v472_v4 }
 0x1b4   :  { %v474_v6 = vsub.f32 1.5, %v473_v5 }
 0x1b6   :  { %v475_v7 = vmul.f32 %v812_v2, %v474_v6 }
 0x1b8   :  { %v479_v9 = vsel %vm478_vm12, %v812_v2, %v475_v7 }
 0x1b9   :  { %v480_v10 = vmul.f32 %v479_v9, %v459_v46 }
 0x1bb   :  { %v484_v12 = vmul.f32 %v800_v8, %v480_v10 }
 0x1bd   :  { %v488_v13 = vadd.f32 %v801_v11, %v484_v12 }
 0x1bf   :  { %v489_v14 = vsub.f32 0.0, %v488_v13 }
 0x1c1   :  { %v490_v15 = vmul.f32 1.442695, %v489_v14 }
 0x1c3   :  { %813 = vpow2.f32 %v490_v15 }
 0x1c9   :  { %v814_v16 = vpop.eup %813 }
 0x1ca   :  { %v492_v17 = vadd.f32 1.0, %v814_v16 }
 0x1cc   :  { %815 = vrcp.f32 %v492_v17 }
 0x1d2   :  { %v816_v18 = vpop.eup %815 }
 0x1d3   :  { %v494_v19 = vpack.c.bf16 %v816_v18, %v816_v18 }
 0x1d5   :  { %756 = vmatmul.msk.bf16.vlgmr.msrb.gmra.mxu0 %vm543_vm13, %v494_v19 }
 0x252   :  { %v560_v21 = vpop.f32.mrf.mxu0 }
 0x253   :  { %v561_v22 = vadd.f32 %v802_v20, %v560_v21 }
 0x255   :  { %v565_v23 = vsel %vm564_vm14, %v561_v22, -inf }
 0x256   :  { %566 = vmax.xlane.f32.xlu0 %v565_v23 }
 0x25a   :  { %v562_v24 = vpop.f32.mrf.mxu0 }
 0x2c9   :  { %v567_v25 = vpop.xlane.xlu0 %566 }
 0x2ca   :  { %v568_v26 = vsub.f32 %v561_v22, %v567_v25 }
 0x2cc   :  { %v569_v27 = vmul.f32 1.442695, %v568_v26 }
 0x2ce   :  { %817 = vpow2.f32 %v569_v27 }
 0x2d4   :  { %v818_v28 = vpop.eup %817 }
 0x2d5   :  { %v571_v29 = vsel %vm564_vm14, %v818_v28, 0.0 }
 0x2d6   :  { %572 = vadd.xlane.f32.xlu0 %v571_v29 }
 0x349   :  { %v573_v30 = vpop.xlane.xlu0 %572 }
 0x34a   :  { %819 = vrcp.f32 %v573_v30  ;;  %v585_v34 = vand.u32 2147483648, %v573_v30  ;;  %v583_v36 = vand.u32 2147483647, %v573_v30  ;;  %vm579_vm0 = vweird.f32 %v573_v30 }
 0x34c   :  { %v586_v38 = vor.u32 1.1754944e-38, %v585_v34  ;;  %vm584_vm2 = vcmp.eq.f32.partialorder %v583_v36, 8.507059e+37 }
 0x350   :  { %v820_v31 = vpop.eup %819 }
 0x351   :  { %v575_v32 = vmul.f32 %v820_v31, %v573_v30  ;;  %vm580_vm15 = vweird.f32 %v820_v31 }
 0x352   :  { %vm581_vm1 = vmor %vm579_vm0, %vm580_vm15 }
 0x353   :  { %v576_v33 = vsub.f32 1.0, %v575_v32 }
 0x355   :  { %v577_v35 = vmul.f32 %v820_v31, %v576_v33 }
 0x357   :  { %v578_v37 = vadd.f32 %v820_v31, %v577_v35 }
 0x359   :  { %v582_v39 = vsel %vm581_vm1, %v820_v31, %v578_v37 }
 0x35a   :  { %v587_v40 = vsel %vm584_vm2, %v586_v38, %v582_v39 }
 0x35b   :  { %v588_v41 = vmul.f32 %v818_v28, %v587_v40 }
 0x35d   :  { %589 = vst.msk [vmem:[#allocation2] sm:$0x3] %vm564_vm14, %v588_v41 }
 0x35e   :  { %600 = dma.vmem_to_hbm [thread:$0]  %s596_s10, 32, %s598_s24, [#allocation3]  }
 0x35f   :  { %845 = dma.done.wait [#allocation3], 32  }
 0x360   :  { %846 = vsyncadd [#allocation3], 4294967264 }
 0x361   :  { %605 = vsyncpa [#allocation3], 1 }

</bundles_post_ra>
